<compile_context>
chip_gen: v6e
topology: v6e:2x2x1
jax: 0.10.0
libtpu: 0.0.40
codegen_flags: <defaults>
</compile_context>

<pallas_src>
import functools

import jax
import jax.numpy as jnp
from jax import lax
from jax.experimental import pallas as pl
from jax.experimental.pallas import tpu as pltpu


_PAD = 128  # lane halo on each side of the staged activation (must be >= W + 1)


def _mlp3_kernel(*refs, num_layers, H, W):
    """Fully fused MLP_3 forward for one batch element.

    refs = (x_ref, w1_0, wd_0, ..., w1_{L-1}, wd_{L-1}, o_ref, halo_ref)
      x_ref   : (1, Cin, H*W)        input, channels on sublanes, HW on lanes
      w1_l    : (Cout_l, Cin_l)      1x1 conv weight
      wd_l    : (Cout_l, 9)          depthwise 3x3 taps, flattened kh*3 + kw
      o_ref   : (1, Cout_last, H*W)  output
      halo_ref: (C_max, 2*_PAD+H*W)  VMEM staging buffer with zero halos
    """
    x_ref = refs[0]
    w_refs = refs[1:1 + 2 * num_layers]
    o_ref = refs[1 + 2 * num_layers]
    halo_ref = refs[2 + 2 * num_layers]
    HW = H * W
    c_max = halo_ref.shape[0]

    # Zero only the halo lanes, once per grid step (not per layer).  The
    # interior [_PAD, _PAD+HW) is fully rewritten before every read and the
    # halos are never written, so they stay zero for every layer of this step.
    zeros_halo = jnp.zeros((c_max, _PAD), jnp.float32)
    halo_ref[:, :_PAD] = zeros_halo
    halo_ref[:, _PAD + HW:] = zeros_halo

    # Column masks: kill the within-row wrap of the flattened +-1 lane shifts.
    col = lax.broadcasted_iota(jnp.int32, (1, HW), 1) % W
    ok_left = col >= 1          # neighbour (h, w-1) exists
    ok_right = col <= W - 2     # neighbour (h, w+1) exists

    y = x_ref[0].astype(jnp.float32)                       # (Cin, HW)
    for l in range(num_layers):
        w1 = w_refs[2 * l][...]                            # (Cout, Cin)
        wd = w_refs[2 * l + 1][...]                        # (Cout, 9) taps
        co = w1.shape[0]

        # ---- pointwise 1x1 conv: channel matmul on the MXU (N = H*W) ----
        z = jnp.dot(w1, y, preferred_element_type=jnp.float32)   # (Cout, HW)

        # ---- depthwise 3x3, padding=1 ----
        # Stage z once with an aligned, lane-dense store, then accumulate the
        # 9 lane-shifted reads.  Row padding comes from the zero halos; the
        # dw = +-1 wrap across rows is removed with the two lane masks.
        halo_ref[:co, _PAD:_PAD + HW] = z
        acc = jnp.zeros_like(z)
        for dh in (-1, 0, 1):
            for dw in (-1, 0, 1):
                s = dh * W + dw
                shifted = halo_ref[:co, _PAD + s:_PAD + s + HW]
                if dw == -1:
                    shifted = jnp.where(ok_left, shifted, 0.0)
                elif dw == 1:
                    shifted = jnp.where(ok_right, shifted, 0.0)
                k = (dh + 1) * 3 + (dw + 1)
                acc = acc + shifted * wd[:, k:k + 1]       # (Cout,1) lane bcast
        if l < num_layers - 1:                             # ReLU, hidden blocks only
            acc = jnp.maximum(acc, 0.0)
        y = acc

    o_ref[0] = y.astype(o_ref.dtype)                       # lane-dense store


def mlp3_pallas(x_nchw, w1_list, wd_list):
    """x_nchw: (N, Cin, H, W) PyTorch layout.  Returns (N, Cout, H, W)."""
    N, Cin, H, W = x_nchw.shape
    HW = H * W
    num_layers = len(w1_list)
    c_out = int(w1_list[-1].shape[0])
    c_max = max(int(w.shape[0]) for w in w1_list)

    # NCHW maps directly to the kernel's (C, H*W) layout with a free reshape.
    x_flat = x_nchw.reshape(N, Cin, HW)

    weight_args = []
    in_specs = [pl.BlockSpec((1, Cin, HW), lambda n: (n, 0, 0))]
    flops = 0
    for w1, wd in zip(w1_list, wd_list):
        co, ci = int(w1.shape[0]), int(w1.shape[1])
        weight_args += [w1, wd.reshape(co, 9)]
        in_specs += [pl.BlockSpec((co, ci), lambda n: (0, 0)),
                     pl.BlockSpec((co, 9), lambda n: (0, 0))]
        flops += 2 * N * HW * co * (ci + 9)
    bytes_accessed = 4 * (int(x_flat.size) + N * c_out * HW +
                          sum(int(w.size) for w in weight_args))

    kernel = functools.partial(_mlp3_kernel, num_layers=num_layers, H=H, W=W)

    out = pl.pallas_call(
        kernel,
        out_shape=jax.ShapeDtypeStruct((N, c_out, HW), x_nchw.dtype),
        grid_spec=pltpu.PrefetchScalarGridSpec(
            num_scalar_prefetch=0,
            grid=(N,),
            in_specs=in_specs,
            out_specs=pl.BlockSpec((1, c_out, HW), lambda n: (n, 0, 0)),
            scratch_shapes=[
                pltpu.VMEM((c_max, _PAD + HW + _PAD), jnp.float32)],
        ),
        compiler_params=pltpu.CompilerParams(
            dimension_semantics=("parallel",)),
        cost_estimate=pl.CostEstimate(
            flops=flops, transcendentals=0, bytes_accessed=bytes_accessed),
    )(x_flat, *weight_args)
    return out.reshape(N, c_out, H, W)


def init_params(key, in_dim, out_dim, hidden_list):
    """Deterministic synthetic weights matching MLP_3's parameter shapes."""
    w1_list, wd_list = [], []
    lastv = in_dim
    for hidden in list(hidden_list) + [out_dim]:
        key, k1, k2 = jax.random.split(key, 3)
        # Conv2d(lastv, hidden, 1, bias=False) weight (hidden, lastv, 1, 1) -> (hidden, lastv)
        w1 = jax.random.normal(k1, (hidden, lastv), jnp.float32) / jnp.sqrt(
            jnp.float32(lastv))
        # Conv2d(hidden, hidden, 3, pad=1, groups=hidden) weight (hidden, 1, 3, 3) -> (hidden, 3, 3)
        wd = jax.random.normal(k2, (hidden, 3, 3), jnp.float32) / 3.0
        w1_list.append(w1)
        wd_list.append(wd)
        lastv = hidden
    return tuple(w1_list), tuple(wd_list)


def mlp3_reference(x_nchw, w1_list, wd_list):
    """Pure-JAX reference matching the PyTorch forward semantics (NCHW)."""
    y = x_nchw
    num_layers = len(w1_list)
    for l, (w1, wd) in enumerate(zip(w1_list, wd_list)):
        co = w1.shape[0]
        y = lax.conv_general_dilated(
            y, w1[:, :, None, None], (1, 1), 'VALID',
            dimension_numbers=('NCHW', 'OIHW', 'NCHW'))
        y = lax.conv_general_dilated(
            y, wd[:, None, :, :], (1, 1), ((1, 1), (1, 1)),
            dimension_numbers=('NCHW', 'OIHW', 'NCHW'),
            feature_group_count=co)
        if l < num_layers - 1:
            y = jnp.maximum(y, 0.0)
    return y


if __name__ == "__main__":
    key = jax.random.PRNGKey(0)
    in_dim, out_dim, hidden_list = 4, 8, [32, 32]
    N, H, W = 2, 16, 16

    key, kx = jax.random.split(key)
    x = jax.random.normal(kx, (N, in_dim, H, W), jnp.float32)  # NCHW like PyTorch
    w1_list, wd_list = init_params(key, in_dim, out_dim, hidden_list)

    fwd = jax.jit(mlp3_pallas)
    out = jax.block_until_ready(fwd(x, w1_list, wd_list))

    ref = mlp3_reference(x, w1_list, wd_list)
    assert out.shape == (N, out_dim, H, W), out.shape
    max_err = float(jnp.max(jnp.abs(out - ref)))
    assert jnp.allclose(out, ref, rtol=1e-3, atol=1e-3), max_err

    print("KERNEL_OK")
</pallas_src>

<mosaic_0001>
module attributes {stable_mosaic.version = 11 : i64} {
  func.func @_mlp3_kernel(%arg0: i32, %arg1: memref<1x4x256xf32, #tpu.memory_space<vmem>>, %arg2: memref<32x4xf32, #tpu.memory_space<vmem>>, %arg3: memref<32x9xf32, #tpu.memory_space<vmem>>, %arg4: memref<32x32xf32, #tpu.memory_space<vmem>>, %arg5: memref<32x9xf32, #tpu.memory_space<vmem>>, %arg6: memref<8x32xf32, #tpu.memory_space<vmem>>, %arg7: memref<8x9xf32, #tpu.memory_space<vmem>>, %arg8: memref<1x8x256xf32, #tpu.memory_space<vmem>>, %arg9: memref<32x512xf32, #tpu.memory_space<vmem>>) attributes {dimension_semantics = [#tpu.dimension_semantics<parallel>], iteration_bounds = array<i64: 2>, scalar_prefetch = 0 : i64, scratch_operands = 1 : i64, tpu.core_type = #tpu.core_type<tc>, window_params = [{transform_indices = @transform_0, window_bounds = array<i64: 1, 4, 256>}, {pipeline_mode = #tpu.pipeline_mode<synchronous>, transform_indices = @transform_1, window_bounds = array<i64: 32, 4>}, {pipeline_mode = #tpu.pipeline_mode<synchronous>, transform_indices = @transform_2, window_bounds = array<i64: 32, 9>}, {pipeline_mode = #tpu.pipeline_mode<synchronous>, transform_indices = @transform_3, window_bounds = array<i64: 32, 32>}, {pipeline_mode = #tpu.pipeline_mode<synchronous>, transform_indices = @transform_4, window_bounds = array<i64: 32, 9>}, {pipeline_mode = #tpu.pipeline_mode<synchronous>, transform_indices = @transform_5, window_bounds = array<i64: 8, 32>}, {pipeline_mode = #tpu.pipeline_mode<synchronous>, transform_indices = @transform_6, window_bounds = array<i64: 8, 9>}, {transform_indices = @transform_7, window_bounds = array<i64: 1, 8, 256>}]} {
    %cst = arith.constant 0.000000e+00 : f32
    %0 = vector.broadcast %cst : f32 to vector<32x128xf32>
    %c0 = arith.constant 0 : index
    %c0_0 = arith.constant 0 : index
    %1 = vector.load %arg9[%c0, %c0_0] : memref<32x512xf32, #tpu.memory_space<vmem>>, vector<32x128xf32>
    tpu.vector_store %arg9[%c0, %c0_0], %0 {strides = array<i32>} : memref<32x512xf32, #tpu.memory_space<vmem>>, vector<32x128xf32>,
    %c0_1 = arith.constant 0 : index
    %c384 = arith.constant 384 : index
    %2 = vector.load %arg9[%c0_1, %c384] : memref<32x512xf32, #tpu.memory_space<vmem>>, vector<32x128xf32>
    tpu.vector_store %arg9[%c0_1, %c384], %0 {strides = array<i32>} : memref<32x512xf32, #tpu.memory_space<vmem>>, vector<32x128xf32>,
    %3 = tpu.iota {dimensions = array<i32: 1>} : vector<1x256xi32>
    %c16_i32 = arith.constant 16 : i32
    %c0_i32 = arith.constant 0 : i32
    %4 = arith.cmpi eq, %c16_i32, %c0_i32 : i32
    %c1_i32 = arith.constant 1 : i32
    %5 = arith.select %4, %c1_i32, %c16_i32 : i32
    %6 = vector.broadcast %5 : i32 to vector<1x256xi32>
    %7 = arith.remsi %3, %6 : vector<1x256xi32>
    %c0_i32_2 = arith.constant 0 : i32
    %8 = vector.broadcast %c0_i32_2 : i32 to vector<1x256xi32>
    %9 = arith.cmpi ne, %7, %8 : vector<1x256xi32>
    %c0_i32_3 = arith.constant 0 : i32
    %10 = vector.broadcast %c0_i32_3 : i32 to vector<1x256xi32>
    %11 = arith.cmpi slt, %7, %10 : vector<1x256xi32>
    %c0_i32_4 = arith.constant 0 : i32
    %12 = arith.cmpi slt, %5, %c0_i32_4 : i32
    %13 = vector.broadcast %12 : i1 to vector<1x256xi1>
    %14 = vector.broadcast %13 : vector<1x256xi1> to vector<1x256xi1>
    %15 = arith.xori %11, %14 : vector<1x256xi1>
    %16 = arith.andi %15, %9 : vector<1x256xi1>
    %17 = vector.broadcast %5 : i32 to vector<1x256xi32>
    %18 = arith.addi %7, %17 : vector<1x256xi32>
    %19 = arith.select %16, %18, %7 : vector<1x256xi1>, vector<1x256xi32>
    %c1_i32_5 = arith.constant 1 : i32
    %20 = vector.broadcast %c1_i32_5 : i32 to vector<1x256xi32>
    %21 = arith.cmpi sge, %19, %20 : vector<1x256xi32>
    %c14_i32 = arith.constant 14 : i32
    %22 = vector.broadcast %c14_i32 : i32 to vector<1x256xi32>
    %23 = arith.cmpi sle, %19, %22 : vector<1x256xi32>
    %c0_6 = arith.constant 0 : index
    %c0_7 = arith.constant 0 : index
    %c0_8 = arith.constant 0 : index
    %24 = vector.load %arg1[%c0_6, %c0_7, %c0_8] : memref<1x4x256xf32, #tpu.memory_space<vmem>>, vector<1x4x256xf32>
    %25 = vector.shape_cast %24 : vector<1x4x256xf32> to vector<4x256xf32>
    %c0_9 = arith.constant 0 : index
    %c0_10 = arith.constant 0 : index
    %26 = vector.load %arg2[%c0_9, %c0_10] : memref<32x4xf32, #tpu.memory_space<vmem>>, vector<32x4xf32>
    %c0_11 = arith.constant 0 : index
    %c0_12 = arith.constant 0 : index
    %27 = vector.load %arg3[%c0_11, %c0_12] : memref<32x9xf32, #tpu.memory_space<vmem>>, vector<32x9xf32>
    %cst_13 = arith.constant dense<0.000000e+00> : vector<32x256xf32>
    %28 = tpu.matmul %26, %25, %cst_13 {dimension_numbers = #tpu.dot_dimension_numbers<[1], [0], [0], [1], [0, 0, 1, 1], [], []>} : vector<32x4xf32>, vector<4x256xf32>, vector<32x256xf32> -> vector<32x256xf32>
    %c0_14 = arith.constant 0 : index
    %c128 = arith.constant 128 : index
    %29 = vector.load %arg9[%c0_14, %c128] : memref<32x512xf32, #tpu.memory_space<vmem>>, vector<32x256xf32>
    tpu.vector_store %arg9[%c0_14, %c128], %28 {strides = array<i32>} : memref<32x512xf32, #tpu.memory_space<vmem>>, vector<32x256xf32>,
    %cst_15 = arith.constant 0.000000e+00 : f32
    %30 = vector.broadcast %cst_15 : f32 to vector<32x256xf32>
    %c0_16 = arith.constant 0 : index
    %c111 = arith.constant 111 : index
    %31 = vector.load %arg9[%c0_16, %c111] : memref<32x512xf32, #tpu.memory_space<vmem>>, vector<32x256xf32>
    %cst_17 = arith.constant 0.000000e+00 : f32
    %32 = vector.shape_cast %21 : vector<1x256xi1> to vector<1x256xi1>
    %33 = vector.broadcast %32 : vector<1x256xi1> to vector<32x256xi1>
    %34 = vector.broadcast %cst_17 : f32 to vector<32x256xf32>
    %35 = arith.select %33, %31, %34 : vector<32x256xi1>, vector<32x256xf32>
    %36 = vector.extract_strided_slice %27 {offsets = [0, 0], sizes = [32, 1], strides = [1, 1]} : vector<32x9xf32> to vector<32x1xf32>
    %37 = vector.broadcast %36 : vector<32x1xf32> to vector<32x256xf32>
    %38 = arith.mulf %35, %37 : vector<32x256xf32>
    %39 = arith.addf %30, %38 : vector<32x256xf32>
    %c0_18 = arith.constant 0 : index
    %c112 = arith.constant 112 : index
    %40 = vector.load %arg9[%c0_18, %c112] : memref<32x512xf32, #tpu.memory_space<vmem>>, vector<32x256xf32>
    %41 = vector.extract_strided_slice %27 {offsets = [0, 1], sizes = [32, 1], strides = [1, 1]} : vector<32x9xf32> to vector<32x1xf32>
    %42 = vector.broadcast %41 : vector<32x1xf32> to vector<32x256xf32>
    %43 = arith.mulf %40, %42 : vector<32x256xf32>
    %44 = arith.addf %39, %43 : vector<32x256xf32>
    %c0_19 = arith.constant 0 : index
    %c113 = arith.constant 113 : index
    %45 = vector.load %arg9[%c0_19, %c113] : memref<32x512xf32, #tpu.memory_space<vmem>>, vector<32x256xf32>
    %cst_20 = arith.constant 0.000000e+00 : f32
    %46 = vector.shape_cast %23 : vector<1x256xi1> to vector<1x256xi1>
    %47 = vector.broadcast %46 : vector<1x256xi1> to vector<32x256xi1>
    %48 = vector.broadcast %cst_20 : f32 to vector<32x256xf32>
    %49 = arith.select %47, %45, %48 : vector<32x256xi1>, vector<32x256xf32>
    %50 = vector.extract_strided_slice %27 {offsets = [0, 2], sizes = [32, 1], strides = [1, 1]} : vector<32x9xf32> to vector<32x1xf32>
    %51 = vector.broadcast %50 : vector<32x1xf32> to vector<32x256xf32>
    %52 = arith.mulf %49, %51 : vector<32x256xf32>
    %53 = arith.addf %44, %52 : vector<32x256xf32>
    %c0_21 = arith.constant 0 : index
    %c127 = arith.constant 127 : index
    %54 = vector.load %arg9[%c0_21, %c127] : memref<32x512xf32, #tpu.memory_space<vmem>>, vector<32x256xf32>
    %cst_22 = arith.constant 0.000000e+00 : f32
    %55 = vector.shape_cast %21 : vector<1x256xi1> to vector<1x256xi1>
    %56 = vector.broadcast %55 : vector<1x256xi1> to vector<32x256xi1>
    %57 = vector.broadcast %cst_22 : f32 to vector<32x256xf32>
    %58 = arith.select %56, %54, %57 : vector<32x256xi1>, vector<32x256xf32>
    %59 = vector.extract_strided_slice %27 {offsets = [0, 3], sizes = [32, 1], strides = [1, 1]} : vector<32x9xf32> to vector<32x1xf32>
    %60 = vector.broadcast %59 : vector<32x1xf32> to vector<32x256xf32>
    %61 = arith.mulf %58, %60 : vector<32x256xf32>
    %62 = arith.addf %53, %61 : vector<32x256xf32>
    %c0_23 = arith.constant 0 : index
    %c128_24 = arith.constant 128 : index
    %63 = vector.load %arg9[%c0_23, %c128_24] : memref<32x512xf32, #tpu.memory_space<vmem>>, vector<32x256xf32>
    %64 = vector.extract_strided_slice %27 {offsets = [0, 4], sizes = [32, 1], strides = [1, 1]} : vector<32x9xf32> to vector<32x1xf32>
    %65 = vector.broadcast %64 : vector<32x1xf32> to vector<32x256xf32>
    %66 = arith.mulf %63, %65 : vector<32x256xf32>
    %67 = arith.addf %62, %66 : vector<32x256xf32>
    %c0_25 = arith.constant 0 : index
    %c129 = arith.constant 129 : index
    %68 = vector.load %arg9[%c0_25, %c129] : memref<32x512xf32, #tpu.memory_space<vmem>>, vector<32x256xf32>
    %cst_26 = arith.constant 0.000000e+00 : f32
    %69 = vector.shape_cast %23 : vector<1x256xi1> to vector<1x256xi1>
    %70 = vector.broadcast %69 : vector<1x256xi1> to vector<32x256xi1>
    %71 = vector.broadcast %cst_26 : f32 to vector<32x256xf32>
    %72 = arith.select %70, %68, %71 : vector<32x256xi1>, vector<32x256xf32>
    %73 = vector.extract_strided_slice %27 {offsets = [0, 5], sizes = [32, 1], strides = [1, 1]} : vector<32x9xf32> to vector<32x1xf32>
    %74 = vector.broadcast %73 : vector<32x1xf32> to vector<32x256xf32>
    %75 = arith.mulf %72, %74 : vector<32x256xf32>
    %76 = arith.addf %67, %75 : vector<32x256xf32>
    %c0_27 = arith.constant 0 : index
    %c143 = arith.constant 143 : index
    %77 = vector.load %arg9[%c0_27, %c143] : memref<32x512xf32, #tpu.memory_space<vmem>>, vector<32x256xf32>
    %cst_28 = arith.constant 0.000000e+00 : f32
    %78 = vector.shape_cast %21 : vector<1x256xi1> to vector<1x256xi1>
    %79 = vector.broadcast %78 : vector<1x256xi1> to vector<32x256xi1>
    %80 = vector.broadcast %cst_28 : f32 to vector<32x256xf32>
    %81 = arith.select %79, %77, %80 : vector<32x256xi1>, vector<32x256xf32>
    %82 = vector.extract_strided_slice %27 {offsets = [0, 6], sizes = [32, 1], strides = [1, 1]} : vector<32x9xf32> to vector<32x1xf32>
    %83 = vector.broadcast %82 : vector<32x1xf32> to vector<32x256xf32>
    %84 = arith.mulf %81, %83 : vector<32x256xf32>
    %85 = arith.addf %76, %84 : vector<32x256xf32>
    %c0_29 = arith.constant 0 : index
    %c144 = arith.constant 144 : index
    %86 = vector.load %arg9[%c0_29, %c144] : memref<32x512xf32, #tpu.memory_space<vmem>>, vector<32x256xf32>
    %87 = vector.extract_strided_slice %27 {offsets = [0, 7], sizes = [32, 1], strides = [1, 1]} : vector<32x9xf32> to vector<32x1xf32>
    %88 = vector.broadcast %87 : vector<32x1xf32> to vector<32x256xf32>
    %89 = arith.mulf %86, %88 : vector<32x256xf32>
    %90 = arith.addf %85, %89 : vector<32x256xf32>
    %c0_30 = arith.constant 0 : index
    %c145 = arith.constant 145 : index
    %91 = vector.load %arg9[%c0_30, %c145] : memref<32x512xf32, #tpu.memory_space<vmem>>, vector<32x256xf32>
    %cst_31 = arith.constant 0.000000e+00 : f32
    %92 = vector.shape_cast %23 : vector<1x256xi1> to vector<1x256xi1>
    %93 = vector.broadcast %92 : vector<1x256xi1> to vector<32x256xi1>
    %94 = vector.broadcast %cst_31 : f32 to vector<32x256xf32>
    %95 = arith.select %93, %91, %94 : vector<32x256xi1>, vector<32x256xf32>
    %96 = vector.extract_strided_slice %27 {offsets = [0, 8], sizes = [32, 1], strides = [1, 1]} : vector<32x9xf32> to vector<32x1xf32>
    %97 = vector.broadcast %96 : vector<32x1xf32> to vector<32x256xf32>
    %98 = arith.mulf %95, %97 : vector<32x256xf32>
    %99 = arith.addf %90, %98 : vector<32x256xf32>
    %cst_32 = arith.constant 0.000000e+00 : f32
    %100 = vector.broadcast %cst_32 : f32 to vector<32x256xf32>
    %101 = arith.maximumf %99, %100 : vector<32x256xf32>
    %c0_33 = arith.constant 0 : index
    %c0_34 = arith.constant 0 : index
    %102 = vector.load %arg4[%c0_33, %c0_34] : memref<32x32xf32, #tpu.memory_space<vmem>>, vector<32x32xf32>
    %c0_35 = arith.constant 0 : index
    %c0_36 = arith.constant 0 : index
    %103 = vector.load %arg5[%c0_35, %c0_36] : memref<32x9xf32, #tpu.memory_space<vmem>>, vector<32x9xf32>
    %cst_37 = arith.constant dense<0.000000e+00> : vector<32x256xf32>
    %104 = tpu.matmul %102, %101, %cst_37 {dimension_numbers = #tpu.dot_dimension_numbers<[1], [0], [0], [1], [0, 0, 1, 1], [], []>} : vector<32x32xf32>, vector<32x256xf32>, vector<32x256xf32> -> vector<32x256xf32>
    %c0_38 = arith.constant 0 : index
    %c128_39 = arith.constant 128 : index
    %105 = vector.load %arg9[%c0_38, %c128_39] : memref<32x512xf32, #tpu.memory_space<vmem>>, vector<32x256xf32>
    tpu.vector_store %arg9[%c0_38, %c128_39], %104 {strides = array<i32>} : memref<32x512xf32, #tpu.memory_space<vmem>>, vector<32x256xf32>,
    %cst_40 = arith.constant 0.000000e+00 : f32
    %106 = vector.broadcast %cst_40 : f32 to vector<32x256xf32>
    %c0_41 = arith.constant 0 : index
    %c111_42 = arith.constant 111 : index
    %107 = vector.load %arg9[%c0_41, %c111_42] : memref<32x512xf32, #tpu.memory_space<vmem>>, vector<32x256xf32>
    %cst_43 = arith.constant 0.000000e+00 : f32
    %108 = vector.shape_cast %21 : vector<1x256xi1> to vector<1x256xi1>
    %109 = vector.broadcast %108 : vector<1x256xi1> to vector<32x256xi1>
    %110 = vector.broadcast %cst_43 : f32 to vector<32x256xf32>
    %111 = arith.select %109, %107, %110 : vector<32x256xi1>, vector<32x256xf32>
    %112 = vector.extract_strided_slice %103 {offsets = [0, 0], sizes = [32, 1], strides = [1, 1]} : vector<32x9xf32> to vector<32x1xf32>
    %113 = vector.broadcast %112 : vector<32x1xf32> to vector<32x256xf32>
    %114 = arith.mulf %111, %113 : vector<32x256xf32>
    %115 = arith.addf %106, %114 : vector<32x256xf32>
    %c0_44 = arith.constant 0 : index
    %c112_45 = arith.constant 112 : index
    %116 = vector.load %arg9[%c0_44, %c112_45] : memref<32x512xf32, #tpu.memory_space<vmem>>, vector<32x256xf32>
    %117 = vector.extract_strided_slice %103 {offsets = [0, 1], sizes = [32, 1], strides = [1, 1]} : vector<32x9xf32> to vector<32x1xf32>
    %118 = vector.broadcast %117 : vector<32x1xf32> to vector<32x256xf32>
    %119 = arith.mulf %116, %118 : vector<32x256xf32>
    %120 = arith.addf %115, %119 : vector<32x256xf32>
    %c0_46 = arith.constant 0 : index
    %c113_47 = arith.constant 113 : index
    %121 = vector.load %arg9[%c0_46, %c113_47] : memref<32x512xf32, #tpu.memory_space<vmem>>, vector<32x256xf32>
    %cst_48 = arith.constant 0.000000e+00 : f32
    %122 = vector.shape_cast %23 : vector<1x256xi1> to vector<1x256xi1>
    %123 = vector.broadcast %122 : vector<1x256xi1> to vector<32x256xi1>
    %124 = vector.broadcast %cst_48 : f32 to vector<32x256xf32>
    %125 = arith.select %123, %121, %124 : vector<32x256xi1>, vector<32x256xf32>
    %126 = vector.extract_strided_slice %103 {offsets = [0, 2], sizes = [32, 1], strides = [1, 1]} : vector<32x9xf32> to vector<32x1xf32>
    %127 = vector.broadcast %126 : vector<32x1xf32> to vector<32x256xf32>
    %128 = arith.mulf %125, %127 : vector<32x256xf32>
    %129 = arith.addf %120, %128 : vector<32x256xf32>
    %c0_49 = arith.constant 0 : index
    %c127_50 = arith.constant 127 : index
    %130 = vector.load %arg9[%c0_49, %c127_50] : memref<32x512xf32, #tpu.memory_space<vmem>>, vector<32x256xf32>
    %cst_51 = arith.constant 0.000000e+00 : f32
    %131 = vector.shape_cast %21 : vector<1x256xi1> to vector<1x256xi1>
    %132 = vector.broadcast %131 : vector<1x256xi1> to vector<32x256xi1>
    %133 = vector.broadcast %cst_51 : f32 to vector<32x256xf32>
    %134 = arith.select %132, %130, %133 : vector<32x256xi1>, vector<32x256xf32>
    %135 = vector.extract_strided_slice %103 {offsets = [0, 3], sizes = [32, 1], strides = [1, 1]} : vector<32x9xf32> to vector<32x1xf32>
    %136 = vector.broadcast %135 : vector<32x1xf32> to vector<32x256xf32>
    %137 = arith.mulf %134, %136 : vector<32x256xf32>
    %138 = arith.addf %129, %137 : vector<32x256xf32>
    %c0_52 = arith.constant 0 : index
    %c128_53 = arith.constant 128 : index
    %139 = vector.load %arg9[%c0_52, %c128_53] : memref<32x512xf32, #tpu.memory_space<vmem>>, vector<32x256xf32>
    %140 = vector.extract_strided_slice %103 {offsets = [0, 4], sizes = [32, 1], strides = [1, 1]} : vector<32x9xf32> to vector<32x1xf32>
    %141 = vector.broadcast %140 : vector<32x1xf32> to vector<32x256xf32>
    %142 = arith.mulf %139, %141 : vector<32x256xf32>
    %143 = arith.addf %138, %142 : vector<32x256xf32>
    %c0_54 = arith.constant 0 : index
    %c129_55 = arith.constant 129 : index
    %144 = vector.load %arg9[%c0_54, %c129_55] : memref<32x512xf32, #tpu.memory_space<vmem>>, vector<32x256xf32>
    %cst_56 = arith.constant 0.000000e+00 : f32
    %145 = vector.shape_cast %23 : vector<1x256xi1> to vector<1x256xi1>
    %146 = vector.broadcast %145 : vector<1x256xi1> to vector<32x256xi1>
    %147 = vector.broadcast %cst_56 : f32 to vector<32x256xf32>
    %148 = arith.select %146, %144, %147 : vector<32x256xi1>, vector<32x256xf32>
    %149 = vector.extract_strided_slice %103 {offsets = [0, 5], sizes = [32, 1], strides = [1, 1]} : vector<32x9xf32> to vector<32x1xf32>
    %150 = vector.broadcast %149 : vector<32x1xf32> to vector<32x256xf32>
    %151 = arith.mulf %148, %150 : vector<32x256xf32>
    %152 = arith.addf %143, %151 : vector<32x256xf32>
    %c0_57 = arith.constant 0 : index
    %c143_58 = arith.constant 143 : index
    %153 = vector.load %arg9[%c0_57, %c143_58] : memref<32x512xf32, #tpu.memory_space<vmem>>, vector<32x256xf32>
    %cst_59 = arith.constant 0.000000e+00 : f32
    %154 = vector.shape_cast %21 : vector<1x256xi1> to vector<1x256xi1>
    %155 = vector.broadcast %154 : vector<1x256xi1> to vector<32x256xi1>
    %156 = vector.broadcast %cst_59 : f32 to vector<32x256xf32>
    %157 = arith.select %155, %153, %156 : vector<32x256xi1>, vector<32x256xf32>
    %158 = vector.extract_strided_slice %103 {offsets = [0, 6], sizes = [32, 1], strides = [1, 1]} : vector<32x9xf32> to vector<32x1xf32>
    %159 = vector.broadcast %158 : vector<32x1xf32> to vector<32x256xf32>
    %160 = arith.mulf %157, %159 : vector<32x256xf32>
    %161 = arith.addf %152, %160 : vector<32x256xf32>
    %c0_60 = arith.constant 0 : index
    %c144_61 = arith.constant 144 : index
    %162 = vector.load %arg9[%c0_60, %c144_61] : memref<32x512xf32, #tpu.memory_space<vmem>>, vector<32x256xf32>
    %163 = vector.extract_strided_slice %103 {offsets = [0, 7], sizes = [32, 1], strides = [1, 1]} : vector<32x9xf32> to vector<32x1xf32>
    %164 = vector.broadcast %163 : vector<32x1xf32> to vector<32x256xf32>
    %165 = arith.mulf %162, %164 : vector<32x256xf32>
    %166 = arith.addf %161, %165 : vector<32x256xf32>
    %c0_62 = arith.constant 0 : index
    %c145_63 = arith.constant 145 : index
    %167 = vector.load %arg9[%c0_62, %c145_63] : memref<32x512xf32, #tpu.memory_space<vmem>>, vector<32x256xf32>
    %cst_64 = arith.constant 0.000000e+00 : f32
    %168 = vector.shape_cast %23 : vector<1x256xi1> to vector<1x256xi1>
    %169 = vector.broadcast %168 : vector<1x256xi1> to vector<32x256xi1>
    %170 = vector.broadcast %cst_64 : f32 to vector<32x256xf32>
    %171 = arith.select %169, %167, %170 : vector<32x256xi1>, vector<32x256xf32>
    %172 = vector.extract_strided_slice %103 {offsets = [0, 8], sizes = [32, 1], strides = [1, 1]} : vector<32x9xf32> to vector<32x1xf32>
    %173 = vector.broadcast %172 : vector<32x1xf32> to vector<32x256xf32>
    %174 = arith.mulf %171, %173 : vector<32x256xf32>
    %175 = arith.addf %166, %174 : vector<32x256xf32>
    %cst_65 = arith.constant 0.000000e+00 : f32
    %176 = vector.broadcast %cst_65 : f32 to vector<32x256xf32>
    %177 = arith.maximumf %175, %176 : vector<32x256xf32>
    %c0_66 = arith.constant 0 : index
    %c0_67 = arith.constant 0 : index
    %178 = vector.load %arg6[%c0_66, %c0_67] : memref<8x32xf32, #tpu.memory_space<vmem>>, vector<8x32xf32>
    %c0_68 = arith.constant 0 : index
    %c0_69 = arith.constant 0 : index
    %179 = vector.load %arg7[%c0_68, %c0_69] : memref<8x9xf32, #tpu.memory_space<vmem>>, vector<8x9xf32>
    %cst_70 = arith.constant dense<0.000000e+00> : vector<8x256xf32>
    %180 = tpu.matmul %178, %177, %cst_70 {dimension_numbers = #tpu.dot_dimension_numbers<[1], [0], [0], [1], [0, 0, 1, 1], [], []>} : vector<8x32xf32>, vector<32x256xf32>, vector<8x256xf32> -> vector<8x256xf32>
    %c0_71 = arith.constant 0 : index
    %c128_72 = arith.constant 128 : index
    %181 = vector.load %arg9[%c0_71, %c128_72] : memref<32x512xf32, #tpu.memory_space<vmem>>, vector<8x256xf32>
    tpu.vector_store %arg9[%c0_71, %c128_72], %180 {strides = array<i32>} : memref<32x512xf32, #tpu.memory_space<vmem>>, vector<8x256xf32>,
    %cst_73 = arith.constant 0.000000e+00 : f32
    %182 = vector.broadcast %cst_73 : f32 to vector<8x256xf32>
    %c0_74 = arith.constant 0 : index
    %c111_75 = arith.constant 111 : index
    %183 = vector.load %arg9[%c0_74, %c111_75] : memref<32x512xf32, #tpu.memory_space<vmem>>, vector<8x256xf32>
    %cst_76 = arith.constant 0.000000e+00 : f32
    %184 = vector.shape_cast %21 : vector<1x256xi1> to vector<1x256xi1>
    %185 = vector.broadcast %184 : vector<1x256xi1> to vector<8x256xi1>
    %186 = vector.broadcast %cst_76 : f32 to vector<8x256xf32>
    %187 = arith.select %185, %183, %186 : vector<8x256xi1>, vector<8x256xf32>
    %188 = vector.extract_strided_slice %179 {offsets = [0, 0], sizes = [8, 1], strides = [1, 1]} : vector<8x9xf32> to vector<8x1xf32>
    %189 = vector.broadcast %188 : vector<8x1xf32> to vector<8x256xf32>
    %190 = arith.mulf %187, %189 : vector<8x256xf32>
    %191 = arith.addf %182, %190 : vector<8x256xf32>
    %c0_77 = arith.constant 0 : index
    %c112_78 = arith.constant 112 : index
    %192 = vector.load %arg9[%c0_77, %c112_78] : memref<32x512xf32, #tpu.memory_space<vmem>>, vector<8x256xf32>
    %193 = vector.extract_strided_slice %179 {offsets = [0, 1], sizes = [8, 1], strides = [1, 1]} : vector<8x9xf32> to vector<8x1xf32>
    %194 = vector.broadcast %193 : vector<8x1xf32> to vector<8x256xf32>
    %195 = arith.mulf %192, %194 : vector<8x256xf32>
    %196 = arith.addf %191, %195 : vector<8x256xf32>
    %c0_79 = arith.constant 0 : index
    %c113_80 = arith.constant 113 : index
    %197 = vector.load %arg9[%c0_79, %c113_80] : memref<32x512xf32, #tpu.memory_space<vmem>>, vector<8x256xf32>
    %cst_81 = arith.constant 0.000000e+00 : f32
    %198 = vector.shape_cast %23 : vector<1x256xi1> to vector<1x256xi1>
    %199 = vector.broadcast %198 : vector<1x256xi1> to vector<8x256xi1>
    %200 = vector.broadcast %cst_81 : f32 to vector<8x256xf32>
    %201 = arith.select %199, %197, %200 : vector<8x256xi1>, vector<8x256xf32>
    %202 = vector.extract_strided_slice %179 {offsets = [0, 2], sizes = [8, 1], strides = [1, 1]} : vector<8x9xf32> to vector<8x1xf32>
    %203 = vector.broadcast %202 : vector<8x1xf32> to vector<8x256xf32>
    %204 = arith.mulf %201, %203 : vector<8x256xf32>
    %205 = arith.addf %196, %204 : vector<8x256xf32>
    %c0_82 = arith.constant 0 : index
    %c127_83 = arith.constant 127 : index
    %206 = vector.load %arg9[%c0_82, %c127_83] : memref<32x512xf32, #tpu.memory_space<vmem>>, vector<8x256xf32>
    %cst_84 = arith.constant 0.000000e+00 : f32
    %207 = vector.shape_cast %21 : vector<1x256xi1> to vector<1x256xi1>
    %208 = vector.broadcast %207 : vector<1x256xi1> to vector<8x256xi1>
    %209 = vector.broadcast %cst_84 : f32 to vector<8x256xf32>
    %210 = arith.select %208, %206, %209 : vector<8x256xi1>, vector<8x256xf32>
    %211 = vector.extract_strided_slice %179 {offsets = [0, 3], sizes = [8, 1], strides = [1, 1]} : vector<8x9xf32> to vector<8x1xf32>
    %212 = vector.broadcast %211 : vector<8x1xf32> to vector<8x256xf32>
    %213 = arith.mulf %210, %212 : vector<8x256xf32>
    %214 = arith.addf %205, %213 : vector<8x256xf32>
    %c0_85 = arith.constant 0 : index
    %c128_86 = arith.constant 128 : index
    %215 = vector.load %arg9[%c0_85, %c128_86] : memref<32x512xf32, #tpu.memory_space<vmem>>, vector<8x256xf32>
    %216 = vector.extract_strided_slice %179 {offsets = [0, 4], sizes = [8, 1], strides = [1, 1]} : vector<8x9xf32> to vector<8x1xf32>
    %217 = vector.broadcast %216 : vector<8x1xf32> to vector<8x256xf32>
    %218 = arith.mulf %215, %217 : vector<8x256xf32>
    %219 = arith.addf %214, %218 : vector<8x256xf32>
    %c0_87 = arith.constant 0 : index
    %c129_88 = arith.constant 129 : index
    %220 = vector.load %arg9[%c0_87, %c129_88] : memref<32x512xf32, #tpu.memory_space<vmem>>, vector<8x256xf32>
    %cst_89 = arith.constant 0.000000e+00 : f32
    %221 = vector.shape_cast %23 : vector<1x256xi1> to vector<1x256xi1>
    %222 = vector.broadcast %221 : vector<1x256xi1> to vector<8x256xi1>
    %223 = vector.broadcast %cst_89 : f32 to vector<8x256xf32>
    %224 = arith.select %222, %220, %223 : vector<8x256xi1>, vector<8x256xf32>
    %225 = vector.extract_strided_slice %179 {offsets = [0, 5], sizes = [8, 1], strides = [1, 1]} : vector<8x9xf32> to vector<8x1xf32>
    %226 = vector.broadcast %225 : vector<8x1xf32> to vector<8x256xf32>
    %227 = arith.mulf %224, %226 : vector<8x256xf32>
    %228 = arith.addf %219, %227 : vector<8x256xf32>
    %c0_90 = arith.constant 0 : index
    %c143_91 = arith.constant 143 : index
    %229 = vector.load %arg9[%c0_90, %c143_91] : memref<32x512xf32, #tpu.memory_space<vmem>>, vector<8x256xf32>
    %cst_92 = arith.constant 0.000000e+00 : f32
    %230 = vector.shape_cast %21 : vector<1x256xi1> to vector<1x256xi1>
    %231 = vector.broadcast %230 : vector<1x256xi1> to vector<8x256xi1>
    %232 = vector.broadcast %cst_92 : f32 to vector<8x256xf32>
    %233 = arith.select %231, %229, %232 : vector<8x256xi1>, vector<8x256xf32>
    %234 = vector.extract_strided_slice %179 {offsets = [0, 6], sizes = [8, 1], strides = [1, 1]} : vector<8x9xf32> to vector<8x1xf32>
    %235 = vector.broadcast %234 : vector<8x1xf32> to vector<8x256xf32>
    %236 = arith.mulf %233, %235 : vector<8x256xf32>
    %237 = arith.addf %228, %236 : vector<8x256xf32>
    %c0_93 = arith.constant 0 : index
    %c144_94 = arith.constant 144 : index
    %238 = vector.load %arg9[%c0_93, %c144_94] : memref<32x512xf32, #tpu.memory_space<vmem>>, vector<8x256xf32>
    %239 = vector.extract_strided_slice %179 {offsets = [0, 7], sizes = [8, 1], strides = [1, 1]} : vector<8x9xf32> to vector<8x1xf32>
    %240 = vector.broadcast %239 : vector<8x1xf32> to vector<8x256xf32>
    %241 = arith.mulf %238, %240 : vector<8x256xf32>
    %242 = arith.addf %237, %241 : vector<8x256xf32>
    %c0_95 = arith.constant 0 : index
    %c145_96 = arith.constant 145 : index
    %243 = vector.load %arg9[%c0_95, %c145_96] : memref<32x512xf32, #tpu.memory_space<vmem>>, vector<8x256xf32>
    %cst_97 = arith.constant 0.000000e+00 : f32
    %244 = vector.shape_cast %23 : vector<1x256xi1> to vector<1x256xi1>
    %245 = vector.broadcast %244 : vector<1x256xi1> to vector<8x256xi1>
    %246 = vector.broadcast %cst_97 : f32 to vector<8x256xf32>
    %247 = arith.select %245, %243, %246 : vector<8x256xi1>, vector<8x256xf32>
    %248 = vector.extract_strided_slice %179 {offsets = [0, 8], sizes = [8, 1], strides = [1, 1]} : vector<8x9xf32> to vector<8x1xf32>
    %249 = vector.broadcast %248 : vector<8x1xf32> to vector<8x256xf32>
    %250 = arith.mulf %247, %249 : vector<8x256xf32>
    %251 = arith.addf %242, %250 : vector<8x256xf32>
    %c0_98 = arith.constant 0 : index
    %c0_99 = arith.constant 0 : index
    %c0_100 = arith.constant 0 : index
    %252 = vector.load %arg8[%c0_98, %c0_99, %c0_100] : memref<1x8x256xf32, #tpu.memory_space<vmem>>, vector<1x8x256xf32>
    %253 = vector.shape_cast %252 : vector<1x8x256xf32> to vector<8x256xf32>
    %254 = vector.shape_cast %251 : vector<8x256xf32> to vector<1x8x256xf32>
    tpu.vector_store %arg8[%c0_98, %c0_99, %c0_100], %254 {strides = array<i32>} : memref<1x8x256xf32, #tpu.memory_space<vmem>>, vector<1x8x256xf32>,
    return
  }
  func.func @transform_0(%arg0: i32) -> (i32, i32, i32) {
    %c0_i32 = arith.constant 0 : i32
    %c0_i32_0 = arith.constant 0 : i32
    %c0_i32_1 = arith.constant 0 : i32
    return %arg0, %c0_i32, %c0_i32_0 : i32, i32, i32
  }
  func.func @transform_1(%arg0: i32) -> (i32, i32) {
    %c0_i32 = arith.constant 0 : i32
    %c0_i32_0 = arith.constant 0 : i32
    %c0_i32_1 = arith.constant 0 : i32
    return %c0_i32, %c0_i32_0 : i32, i32
  }
  func.func @transform_2(%arg0: i32) -> (i32, i32) {
    %c0_i32 = arith.constant 0 : i32
    %c0_i32_0 = arith.constant 0 : i32
    %c0_i32_1 = arith.constant 0 : i32
    return %c0_i32, %c0_i32_0 : i32, i32
  }
  func.func @transform_3(%arg0: i32) -> (i32, i32) {
    %c0_i32 = arith.constant 0 : i32
    %c0_i32_0 = arith.constant 0 : i32
    %c0_i32_1 = arith.constant 0 : i32
    return %c0_i32, %c0_i32_0 : i32, i32
  }
  func.func @transform_4(%arg0: i32) -> (i32, i32) {
    %c0_i32 = arith.constant 0 : i32
    %c0_i32_0 = arith.constant 0 : i32
    %c0_i32_1 = arith.constant 0 : i32
    return %c0_i32, %c0_i32_0 : i32, i32
  }
  func.func @transform_5(%arg0: i32) -> (i32, i32) {
    %c0_i32 = arith.constant 0 : i32
    %c0_i32_0 = arith.constant 0 : i32
    %c0_i32_1 = arith.constant 0 : i32
    return %c0_i32, %c0_i32_0 : i32, i32
  }
  func.func @transform_6(%arg0: i32) -> (i32, i32) {
    %c0_i32 = arith.constant 0 : i32
    %c0_i32_0 = arith.constant 0 : i32
    %c0_i32_1 = arith.constant 0 : i32
    return %c0_i32, %c0_i32_0 : i32, i32
  }
  func.func @transform_7(%arg0: i32) -> (i32, i32, i32) {
    %c0_i32 = arith.constant 0 : i32
    %c0_i32_0 = arith.constant 0 : i32
    %c0_i32_1 = arith.constant 0 : i32
    return %arg0, %c0_i32, %c0_i32_0 : i32, i32, i32
  }
}

</mosaic_0001>

<bundles_post_ra>
// kernel: mlp3_pallas.1
= control target key start
LH: loop header
LB: loop body
LE: loop exit
PB: predicated region body
PF: predicated region fallthrough
CT: control target
= control target key end

     0   :  { %s2680_s24 = smov 0   ;;  %s4475_s0 = inlined_call_operand.vmem [shape: f32[2,4,256], index: 0, kind: input, shape index: {}]   ;;  %s4476_s1 = inlined_call_operand.vmem [shape: f32[32,4], index: 1, kind: input, shape index: {}]   ;;  %s4477_s2 = inlined_call_operand.vmem [shape: f32[32,9], index: 2, kind: input, shape index: {}]   ;;  %s4478_s3 = inlined_call_operand.vmem [shape: f32[32,32], index: 3, kind: input, shape index: {}]   ;;  %s4479_s4 = inlined_call_operand.vmem [shape: f32[32,9], index: 4, kind: input, shape index: {}]   ;;  %s4480_s5 = inlined_call_operand.vmem [shape: f32[8,32], index: 5, kind: input, shape index: {}]   ;;  %s4481_s6 = inlined_call_operand.vmem [shape: f32[8,9], index: 6, kind: input, shape index: {}]   ;;  %s4482_s7 = inlined_call_operand.vmem [shape: f32[2,8,256], index: 7, kind: output, shape index: {}]  }
   0x1 LB: > { %s2394_s25 = sadd.s32 4294967295, %s2620_s24   ;;  %p2398_p0 = scmp.ge.s32.totalorder %s2620_s24, 1  ;;  %s2620_s24 = sphi %s2680_s24, %s17_s24  }
   0x2   : > { %p237_p1 = scmp.lt.s32.totalorder %s2620_s24, 3 }
   0x4   : > { %p238_p2 = pnand %p2398_p0, %p237_p1 }
   0x6   : > { %241 = sbr.rel (%p238_p2) target bundleno = 1302 (0x516), region = 48 }
   0xb   : > { %p269_p3 = scmp.lt.s32.totalorder %s2394_s25, 1  ;;  %v4497_v0 = vmov 0   ;;  %v4495_v1 = vmov 0.0   ;;  %s2624_s26 = smov 17   ;;  %v2699_v2 = vld [vmem:[%s4477_s2] sm:$0xff]  ;;  %vm342_vm0 = vcmask 1043456  }
   0xc   : > { %2454 = vset.pattern.permute.xlu0 %v4497_v0  ;;  %411 = vmatprep.mubr.f32.mxu0 %v4495_v1  ;;  %v2711_v5 = vld [vmem:[%s4477_s2 + $0x8] sm:$0xff]  ;;  %v2716_v6 = vld [vmem:[%s4477_s2 + $0x18] sm:$0xff]  ;;  %v319_v7 = vld [vmem:[%s4476_s1] sm:$0xff]  ;;  %vm329_vm1 = vcmask 31744   ;;  %v4499_v10 = vmov 7   ;;  %v4501_v12 = vmov 1  }
   0xd   : > { %s4761_s25 = smov (!%p269_p3, %s2394_s25), 1  ;;  %2455 = vset.pattern.permute.xlu1 %v4497_v0  ;;  %1293 = vmatprep.mubr.f32.mxu1 %v4495_v1  ;;  %v2727_v8 = vld [vmem:[%s4477_s2 + $0x10] sm:$0xff]  ;;  %v320_v9 = vld [vmem:[%s4476_s1 + $0x8] sm:$0xff]  ;;  %v322_v13 = vld [vmem:[%s4476_s1 + $0x18] sm:$0xff]  ;;  %v4491_v14 = vmov 3   ;;  %v4493_v15 = vmov 2  }
   0xe   : > { %2445 = vrot.lane.b32.xlu0 %v4495_v1, %s2624_s26  ;;  %s2416_s29 = sshll.u32 %s4761_s25, 3  ;;  %2450 = vrot.lane.b32.xlu1 %v4495_v1, %s2624_s26  ;;  %v321_v11 = vld [vmem:[%s4476_s1 + $0x10] sm:$0xff]  ;;  %v4489_v16 = vmov 4   ;;  %s2630_s27 = smov 15   ;;  %v4487_v17 = vmov 6   ;;  %v4483_v18 = vmov 5  }
   0xf   : > { %s273_s9 = scalar_lea.vmem %s4475_s0, %s2416_s29  ;;  %s2631_s28 = smov 127   ;;  %v4485_v19 = vmov 8   ;;  %vm496_vm2 = vcmask 138240   ;;  %vm674_vm4 = vcmask 121856   ;;  %vm755_vm5 = vcmask 7168  }
  0x10   : > { %v318_v3 = vld [vmem:[%s273_s9] sm:$0xff]  ;;  %s2633_s29 = smov 113   ;;  %s2635_s30 = smov 1   ;;  %vm621_vm7 = vcmask 130048   ;;  %vm892_vm10 = vcmask 1039360   ;;  %vm973_vm11 = vcmask 924672  }
  0x11   : > { %v328_v4 = vcombine.high %v318_v3, %v318_v3  ;;  %s2637_s8 = smov 111   ;;  %s2638_s9 = smov 16   ;;  %vm1143_vm12 = vcmask 908288   ;;  %vm1094_vm13 = vcmask 916480   ;;  %vm1216_vm14 = vcmask 261120  }
  0x12   : > { %523 = vperm.xlu0 %2454, %v2699_v2   ;;  %528 = vperm.xlu1 %2455, %v2711_v5   ;;  %s2639_s10 = smov 112  }
  0x13   : > { %2403 = vmatprep.subr.msk.mxu0 %vm342_vm0, %v328_v4 }
  0x14   : > { %2404 = vmatpush1.msk.msra.mxu0 %vm342_vm0, %v318_v3 }
  0x15   : > { %2405 = vmatmul.mubr.msk.f32.vlgmr.msra.gmra.mxu0 %vm329_vm1, %v319_v7 }
  0x16   : > { %538 = vperm.xlu0 %2454, %v2716_v6   ;;  %417 = vmatprep.mubr.f32.mxu0 %v4495_v1 }
  0x17   : > { %533 = vperm.xlu1 %2455, %v2727_v8  }
  0x19   : > { %2406 = vmatmul.mubr.msk.f32.gmra.mxu0 %vm329_vm1, %v320_v9 }
  0x1a   : > { %2457 = vset.pattern.permute.xlu0 %v4499_v10  ;;  %423 = vmatprep.mubr.f32.mxu0 %v4495_v1 }
  0x1b   : > { %1043 = vperm.xlu0 %2457, %v2716_v6   ;;  %2456 = vset.pattern.permute.xlu1 %v4501_v12 }
  0x1c   : > { %570 = vperm.xlu1 %2456, %v2716_v6  }
  0x1d   : > { %2407 = vmatmul.mubr.msk.f32.gmra.mxu0 %vm329_vm1, %v321_v11 }
  0x1e   : > { %429 = vmatprep.mubr.f32.mxu0 %v4495_v1 }
  0x1f   : > { %1031 = vperm.xlu0 %2457, %v2699_v2  }
  0x20   : > { %562 = vperm.xlu1 %2456, %v2711_v5  }
  0x21   : > { %2408 = vmatmul.mubr.msk.f32.gmra.mxu0 %vm329_vm1, %v322_v13 }
  0x22   : > { %2143 = vmatprep.mubr.f32.mxu0 %v4495_v1 }
  0x23   : > { %2467 = vset.pattern.permute.xlu0 %v4491_v14 }
  0x24   : > { %789 = vperm.xlu0 %2467, %v2727_v8   ;;  %558 = vperm.xlu1 %2456, %v2699_v2  }
  0x28   : > { %2468 = vset.pattern.permute.xlu0 %v4493_v15  ;;  %2458 = vset.pattern.permute.xlu1 %v4499_v10 }
  0x29   : > { %708 = vperm.xlu0 %2468, %v2727_v8   ;;  %1039 = vperm.xlu1 %2458, %v2727_v8  }
  0x2d   : > { %700 = vperm.xlu0 %2468, %v2699_v2   ;;  %1035 = vperm.xlu1 %2458, %v2711_v5  }
  0x31   : > { %2481 = vset.pattern.permute.xlu0 %v4489_v16  ;;  %2460 = vrot.lane.b32.xlu1 %v4495_v1, %s2630_s27 }
  0x32   : > { %821 = vperm.xlu0 %2481, %v2727_v8   ;;  %2464 = vset.pattern.permute.xlu1 %v4493_v15 }
  0x35   : > { %712 = vperm.xlu1 %2464, %v2716_v6  }
  0x36   : > { %817 = vperm.xlu0 %2481, %v2711_v5  }
  0x39   : > { %2465 = vset.pattern.permute.xlu1 %v4491_v14 }
  0x3a   : > { %2486 = vrot.lane.b32.xlu0 %v4495_v1, %s2631_s28  ;;  %793 = vperm.xlu1 %2465, %v2716_v6  }
  0x3e   : > { %813 = vperm.xlu0 %2481, %v2699_v2   ;;  %2466 = vset.pattern.permute.xlu1 %v4493_v15 }
  0x3f   : > { %704 = vperm.xlu1 %2466, %v2711_v5  }
  0x42   : > { %2495 = vset.pattern.permute.xlu0 %v4487_v17 }
  0x43   : > { %1011 = vperm.xlu0 %2495, %v2716_v6   ;;  %2469 = vset.pattern.permute.xlu1 %v4489_v16 }
  0x44   : > { %825 = vperm.xlu1 %2469, %v2716_v6  }
  0x47   : > { %1007 = vperm.xlu0 %2495, %v2727_v8  }
  0x48   : > { %2471 = vrot.lane.b32.xlu1 %v4495_v1, %s2630_s27 }
  0x49   : > { %2480 = vset.pattern.permute.xlu1 %v4491_v14 }
  0x4b   : > { %2497 = vrot.lane.b32.xlu0 %v4495_v1, %s2633_s29 }
  0x4c   : > { %2501 = vset.pattern.permute.xlu0 %v4483_v18  ;;  %2476 = vrot.lane.b32.xlu1 %v4495_v1, %s2635_s30 }
  0x4f   : > { %918 = vperm.xlu0 %2501, %v2699_v2  }
  0x50   : > { %785 = vperm.xlu1 %2480, %v2711_v5  }
  0x53   : > { %2503 = vset.pattern.permute.xlu0 %v4485_v19 }
  0x54   : > { %1181 = vperm.xlu0 %2503, %v2716_v6   ;;  %2482 = vset.pattern.permute.xlu1 %v4483_v18 }
  0x55   : > { %930 = vperm.xlu1 %2482, %v2716_v6  }
  0x58   : > { %1177 = vperm.xlu0 %2503, %v2727_v8  }
  0x59   : > { %2483 = vset.pattern.permute.xlu1 %v4491_v14 }
  0x5a   : > { %781 = vperm.xlu1 %2483, %v2699_v2  }
  0x5c   : > { %2509 = vset.pattern.permute.xlu0 %v4501_v12 }
  0x5d   : > { %566 = vperm.xlu0 %2509, %v2727_v8  }
  0x5e   : > { %2484 = vset.pattern.permute.xlu1 %v4483_v18 }
  0x5f   : > { %926 = vperm.xlu1 %2484, %v2727_v8  }
  0x63   : > { %2491 = vrot.lane.b32.xlu1 %v4495_v1, %s2635_s30 }
  0x67   : > { %922 = vperm.xlu1 %2484, %v2711_v5  }
  0x6b   : > { %2502 = vset.pattern.permute.xlu1 %v4487_v17 }
  0x6c   : > { %1003 = vperm.xlu1 %2502, %v2711_v5  }
  0x70   : > { %2505 = vrot.lane.b32.xlu1 %v4495_v1, %s2631_s28 }
  0x74   : > { %999 = vperm.xlu1 %2502, %v2699_v2  }
  0x78   : > { %2511 = vrot.lane.b32.xlu1 %v4495_v1, %s2633_s29 }
  0x79   : > { %2520 = vset.pattern.permute.xlu1 %v4485_v19 }
  0x7c   : > { %2516 = vrot.lane.b32.xlu1 %v4495_v1, %s2637_s8 }
  0x80   : > { %v2814_v20 = vpop.permute.xlu0 %2445  ;;  %v2816_v21 = vpop.permute.xlu1 %2450 }
  0x8d   : > { %v2818_v22 = vpop.permute.xlu0 %523  ;;  %v2820_v23 = vpop.permute.xlu1 %528 }
  0x8e   : > { %4565 = vst [vmem:[#allocation3_spill] sm:$0xff] %v2818_v22  ;;  %4566 = vst [vmem:[#allocation4_spill] sm:$0xff] %v2820_v23 }
  0x91   : > { %v2822_v24 = vpop.permute.xlu0 %538 }
  0x92   : > { %v2824_v25 = vpop.permute.xlu1 %533 }
  0x96   : > { %v2826_v26 = vpop.permute.xlu0 %1043 }
  0x97   : > { %v2828_v27 = vpop.permute.xlu1 %570  ;;  %v1057_v52 = vmul.f32 0.0, %v2826_v26 }
  0x98   : > { %v582_v32 = vmul.f32 0.0, %v2828_v27 }
  0x9a   : > { %v2830_v28 = vpop.permute.xlu0 %1031 }
  0x9b   : > { %v2832_v29 = vpop.permute.xlu1 %562 }
  0x9c   : > { %v576_v30 = vmul.f32 0.0, %v2832_v29 }
  0x9e   : > { %603 = vrot.lane.b32.xlu0 %v576_v30, %s2638_s9 }
  0x9f   : > { %v2835_v31 = vpop.permute.xlu0 %789  ;;  %v559_v33 = vpop.permute.xlu1 %558 }
  0xa0   : > { %4567 = vst [vmem:[#allocation5_spill] sm:$0xff] %v2835_v31  ;;  %v573_v34 = vmul.f32 0.0, %v559_v33 }
  0xa2   : > { %597 = vrot.lane.b32.xlu1 %v573_v34, %s2638_s9  ;;  %615 = vrot.lane.b32.xlu0 %v582_v32, %s2638_s9 }
  0xa4   : > { %v2841_v35 = vpop.permute.xlu0 %708  ;;  %v2863_v46 = vpop.permute.xlu1 %1039 }
  0xa5   : > { %4568 = vst [vmem:[#allocation6_spill] sm:$0xff] %v2841_v35 }
  0xa8   : > { %v2843_v36 = vpop.permute.xlu0 %700  ;;  %v2871_v49 = vpop.permute.xlu1 %1035 }
  0xa9   : > { %4569 = vst [vmem:[#allocation7_spill] sm:$0xff] %v2843_v36 }
  0xac   : > { %v2880_v53 = vpop.permute.xlu1 %2460 }
  0xad   : > { %v2845_v37 = vpop.permute.xlu0 %821  ;;  %4577 = vst [vmem:[#allocation15_spill] sm:$0xff] %v2880_v53 }
  0xb0   : > { %v2893_v57 = vpop.permute.xlu1 %712 }
  0xb1   : > { %v2847_v38 = vpop.permute.xlu0 %817 }
  0xb5   : > { %v2849_v39 = vpop.permute.xlu0 %2486  ;;  %v2901_v59 = vpop.permute.xlu1 %793 }
  0xb9   : > { %v2851_v40 = vpop.permute.xlu0 %813 }
  0xba   : > { %4570 = vst [vmem:[#allocation8_spill] sm:$0xff] %v2851_v40  ;;  %v2911_v60 = vpop.permute.xlu1 %704  ;;  %v3118_v40 = vld [vmem:[%s4479_s4 + $0x10] sm:$0xff] }
  0xbb   : > { %4579 = vst [vmem:[#allocation17_spill] sm:$0xff] %v2911_v60  ;;  %v4620_v60 = vmov 2  }
  0xbe   : > { %v2853_v41 = vpop.permute.xlu0 %1011 }
  0xbf   : > { %4571 = vst [vmem:[#allocation9_spill] sm:$0xff] %v2853_v41  ;;  %v2917_v61 = vpop.permute.xlu1 %825 }
  0xc2   : > { %v2855_v42 = vpop.permute.xlu0 %1007 }
  0xc3   : > { %4572 = vst [vmem:[#allocation10_spill] sm:$0xff] %v2855_v42  ;;  %v2930_v4 = vpop.permute.xlu1 %2471 }
  0xc6   : > { %v2857_v43 = vpop.permute.xlu0 %2497 }
  0xc7   : > { %v2938_v7 = vpop.permute.xlu1 %2476 }
  0xc8   : > { %v2478_v31 = vunpack.i.l.bf16 %v2938_v7 }
  0xca   : > { %v2859_v44 = vpop.permute.xlu0 %918 }
  0xcb   : > { %4573 = vst [vmem:[#allocation11_spill] sm:$0xff] %v2859_v44  ;;  %v2949_v9 = vpop.permute.xlu1 %785 }
  0xcc   : > { %4580 = vst [vmem:[#allocation18_spill] sm:$0xff] %v2949_v9 }
  0xcf   : > { %v2861_v45 = vpop.permute.xlu0 %1181 }
  0xd0   : > { %4574 = vst [vmem:[#allocation12_spill] sm:$0xff] %v2861_v45  ;;  %v2957_v13 = vpop.permute.xlu1 %930 }
  0xd3   : > { %v2865_v47 = vpop.permute.xlu0 %1177 }
  0xd4   : > { %4575 = vst [vmem:[#allocation13_spill] sm:$0xff] %v2865_v47 }
  0xd5   : > { %v2867_v48 = vpop.f32.mrf.mxu0  ;;  %v2966_v30 = vpop.permute.xlu1 %781 }
  0xd6   : > { %4576 = vst [vmem:[#allocation14_spill] sm:$0xff] %v2867_v48  ;;  %474 = vrot.lane.b32.xlu0 %v2867_v48, %s2624_s26  ;;  %v574_v55 = vmul.f32 %v559_v33, %v2867_v48  ;;  %4581 = vst [vmem:[#allocation19_spill] sm:$0xff] %v2966_v30  ;;  %v4601_v30 = vmov 7  }
  0xd7   : > { %v2882_v54 = vpop.f32.mrf.mxu0 }
  0xd8   : > { %v2873_v50 = vpop.permute.xlu0 %566  ;;  %4578 = vst [vmem:[#allocation16_spill] sm:$0xff] %v2882_v54  ;;  %v575_v63 = vmul.f32 %v559_v33, %v2882_v54 }
  0xd9   : > { %v579_v51 = vmul.f32 0.0, %v2873_v50  ;;  %v2888_v56 = vpop.f32.mrf.mxu0 }
  0xda   : > { %652 = vrot.lane.b32.xlu0 %v2867_v48, %s2630_s27  ;;  %v577_v11 = vmul.f32 %v2832_v29, %v2888_v56 }
  0xdb   : > { %609 = vrot.lane.b32.xlu1 %v579_v51, %s2638_s9  ;;  %v2895_v58 = vpop.f32.mrf.mxu0 }
  0xdc   : > { %v578_v3 = vmul.f32 %v2832_v29, %v2895_v58  ;;  %v2974_v29 = vpop.permute.xlu1 %926 }
  0xdd   : > { %v2919_v62 = vpop.f32.mrf.mxu0  ;;  %4582 = vst [vmem:[#allocation20_spill] sm:$0xff] %v2974_v29 }
  0xde   : > { %868 = vrot.lane.b32.xlu0 %v2867_v48, %s2631_s28  ;;  %v580_v6 = vmul.f32 %v2873_v50, %v2919_v62  ;;  %v1052_v18 = vmul.f32 %v2863_v46, %v2919_v62 }
  0xdf   : > { %1092 = vrot.lane.b32.xlu1 %v1057_v52, %s2639_s10  ;;  %v2943_v8 = vpop.f32.mrf.mxu0 }
  0xe0   : > { %v2986_v34 = vpop.permute.xlu1 %2491  ;;  %v581_v51 = vmul.f32 %v2873_v50, %v2943_v8 }
  0xe1   : > { %v2968_v32 = vpop.f32.mrf.mxu0 }
  0xe2   : > { %599 = vrot.lane.b32.xlu0 %v574_v55, %s2638_s9  ;;  %v1055_v15 = vmul.f32 %v2826_v26, %v2968_v32 }
  0xe3   : > { %733 = vrot.lane.b32.xlu1 %v2867_v48, %s2635_s30  ;;  %v2980_v33 = vpop.f32.mrf.mxu0 }
  0xe4   : > { %v2994_v52 = vpop.permute.xlu1 %922  ;;  %v584_v55 = vmul.f32 %v2828_v27, %v2980_v33  ;;  %v1056_v50 = vmul.f32 %v2826_v26, %v2980_v33 }
  0xe5   : > { %4583 = vst [vmem:[#allocation21_spill] sm:$0xff] %v2994_v52 }
  0xe6   : > { %482 = vrot.lane.b32.xlu0 %v2895_v58, %s2624_s26 }
  0xe7   : > { %476 = vrot.lane.b32.xlu1 %v2882_v54, %s2624_s26 }
  0xea   : > { %660 = vrot.lane.b32.xlu0 %v2895_v58, %s2630_s27 }
  0xeb   : > { %654 = vrot.lane.b32.xlu1 %v2882_v54, %s2630_s27 }
  0xee   : > { %741 = vrot.lane.b32.xlu0 %v2895_v58, %s2635_s30 }
  0xef   : > { %735 = vrot.lane.b32.xlu1 %v2882_v54, %s2635_s30 }
  0xf2   : > { %957 = vrot.lane.b32.xlu0 %v2895_v58, %s2633_s29 }
  0xf3   : > { %870 = vrot.lane.b32.xlu1 %v2882_v54, %s2631_s28 }
  0xf6   : > { %486 = vrot.lane.b32.xlu0 %v2919_v62, %s2624_s26 }
  0xf7   : > { %480 = vrot.lane.b32.xlu1 %v2888_v56, %s2624_s26 }
  0xfa   : > { %607 = vrot.lane.b32.xlu0 %v578_v3, %s2638_s9 }
  0xfb   : > { %601 = vrot.lane.b32.xlu1 %v575_v63, %s2638_s9  ;;  %v3004_v63 = vpop.permute.xlu1 %1003 }
  0xfc   : > { %4584 = vst [vmem:[#allocation22_spill] sm:$0xff] %v3004_v63 }
  0xfe   : > { %961 = vrot.lane.b32.xlu0 %v2919_v62, %s2633_s29 }
  0xff   : > { %658 = vrot.lane.b32.xlu1 %v2888_v56, %s2630_s27  ;;  %v3011_v3 = vpop.permute.xlu1 %2505 }
 0x102   : > { %611 = vrot.lane.b32.xlu0 %v580_v6, %s2638_s9 }
 0x103   : > { %739 = vrot.lane.b32.xlu1 %v2888_v56, %s2635_s30  ;;  %v3017_v6 = vpop.permute.xlu1 %999 }
 0x104   : > { %4585 = vst [vmem:[#allocation23_spill] sm:$0xff] %v3017_v6  ;;  %v4598_v6 = vmov 1  }
 0x106   : > { %666 = vrot.lane.b32.xlu0 %v2943_v8, %s2630_s27 }
 0x107   : > { %874 = vrot.lane.b32.xlu1 %v2888_v56, %s2631_s28 }
 0x10a   : > { %747 = vrot.lane.b32.xlu0 %v2943_v8, %s2635_s30 }
 0x10b   : > { %955 = vrot.lane.b32.xlu1 %v2888_v56, %s2633_s29 }
 0x10e   : > { %882 = vrot.lane.b32.xlu0 %v2943_v8, %s2631_s28 }
 0x10f   : > { %605 = vrot.lane.b32.xlu1 %v577_v11, %s2638_s9  ;;  %v1053_v11 = vmul.f32 %v2863_v46, %v2943_v8 }
 0x112   : > { %963 = vrot.lane.b32.xlu0 %v2943_v8, %s2633_s29 }
 0x113   : > { %876 = vrot.lane.b32.xlu1 %v2895_v58, %s2631_s28 }
 0x116   : > { %492 = vrot.lane.b32.xlu0 %v2968_v32, %s2624_s26 }
 0x117   : > { %664 = vrot.lane.b32.xlu1 %v2919_v62, %s2630_s27 }
 0x11a   : > { %1137 = vrot.lane.b32.xlu0 %v2968_v32, %s2637_s8 }
 0x11b   : > { %745 = vrot.lane.b32.xlu1 %v2919_v62, %s2635_s30 }
 0x11e   : > { %672 = vrot.lane.b32.xlu0 %v2980_v33, %s2630_s27 }
 0x11f   : > { %880 = vrot.lane.b32.xlu1 %v2919_v62, %s2631_s28 }
 0x122   : > { %753 = vrot.lane.b32.xlu0 %v2980_v33, %s2635_s30 }
 0x123   : > { %488 = vrot.lane.b32.xlu1 %v2943_v8, %s2624_s26 }
 0x126   : > { %1139 = vrot.lane.b32.xlu0 %v2980_v33, %s2637_s8 }
 0x127   : > { %613 = vrot.lane.b32.xlu1 %v581_v51, %s2638_s9  ;;  %v3028_v51 = vpop.permute.xlu1 %2511 }
 0x12a   : > { %619 = vrot.lane.b32.xlu0 %v584_v55, %s2638_s9  ;;  %v583_v55 = vmul.f32 %v2828_v27, %v2968_v32  ;;  %v1051_v27 = vmul.f32 0.0, %v2871_v49 }
 0x12b   : > { %670 = vrot.lane.b32.xlu1 %v2968_v32, %s2630_s27  ;;  %v3039_v19 = vpop.permute.xlu1 %2516 }
 0x12e   : > { %1090 = vrot.lane.b32.xlu0 %v1056_v50, %s2639_s10  ;;  %v3032_v50 = vpop.permute.xlu0 %603 }
 0x12f   : > { %751 = vrot.lane.b32.xlu1 %v2968_v32, %s2635_s30  ;;  %4586 = vst [vmem:[#allocation24_spill] sm:$0xff] %v3032_v50 }
 0x132   : > { %951 = vrot.lane.b32.xlu0 %v2882_v54, %s2633_s29 }
 0x133   : > { %886 = vrot.lane.b32.xlu1 %v2968_v32, %s2631_s28 }
 0x136   : > { %1133 = vrot.lane.b32.xlu0 %v2943_v8, %s2637_s8 }
 0x137   : > { %967 = vrot.lane.b32.xlu1 %v2968_v32, %s2633_s29 }
 0x13a   : > { %1084 = vrot.lane.b32.xlu0 %v1053_v11, %s2639_s10  ;;  %v3044_v11 = vpop.permute.xlu0 %615 }
 0x13b   : > { %494 = vrot.lane.b32.xlu1 %v2980_v33, %s2624_s26 }
 0x13e   : > { %1131 = vrot.lane.b32.xlu0 %v2919_v62, %s2637_s8 }
 0x13f   : > { %617 = vrot.lane.b32.xlu1 %v583_v55, %s2638_s9  ;;  %v3051_v55 = vpop.permute.xlu1 %597 }
 0x140   : > { %4587 = vst [vmem:[#allocation25_spill] sm:$0xff] %v3051_v55 }
 0x142   : > { %1082 = vrot.lane.b32.xlu0 %v1052_v18, %s2639_s10  ;;  %v1049_v18 = vmul.f32 %v2871_v49, %v2888_v56 }
 0x143   : > { %888 = vrot.lane.b32.xlu1 %v2980_v33, %s2631_s28 }
 0x146   : > { %2522 = vrot.lane.b32.xlu0 %v4495_v1, %s2637_s8 }
 0x147   : > { %969 = vrot.lane.b32.xlu1 %v2980_v33, %s2633_s29 }
 0x148   : > { %v3053_v17 = vpop.permute.xlu0 %474 }
 0x14a   : > { %1080 = vrot.lane.b32.xlu0 %v1051_v27, %s2639_s10  ;;  %v1054_v27 = vmul.f32 0.0, %v2863_v46  ;;  %v3098_v46 = vld [vmem:[%s4479_s4] sm:$0xff] }
 0x14b   : > { %1173 = vperm.xlu1 %2520, %v2711_v5   ;;  %v1047_v5 = vmul.f32 %v2830_v28, %v2882_v54 }
 0x14c   : > { %v3061_v14 = vpop.permute.xlu0 %652 }
 0x14d   : > { %v3059_v16 = vpop.permute.xlu1 %609  ;;  %4588 = vst [vmem:[#allocation26_spill] sm:$0xff] %v3061_v14 }
 0x14e   : > { %1076 = vrot.lane.b32.xlu0 %v1049_v18, %s2639_s10 }
 0x14f   : > { %1088 = vrot.lane.b32.xlu1 %v1055_v15, %s2639_s10  ;;  %v3087_v15 = vld [vmem:[%s4479_s4 + $0x18] sm:$0xff] }
 0x150   : > { %v3069_v0 = vpop.permute.xlu0 %868  ;;  %4593 = vst [vmem:[#allocation31_spill] sm:$0xff] %v3087_v15 }
 0x151   : > { %v3067_v1 = vpop.permute.xlu1 %1092  ;;  %4590 = vst [vmem:[#allocation28_spill] sm:$0xff] %v3069_v0 }
 0x152   : > { %4589 = vst [vmem:[#allocation27_spill] sm:$0xff] %v3067_v1  ;;  %1072 = vrot.lane.b32.xlu0 %v1047_v5, %s2639_s10 }
 0x153   : > { %949 = vrot.lane.b32.xlu1 %v2867_v48, %s2633_s29 }
 0x154   : > { %v3079_v26 = vpop.permute.xlu0 %599 }
 0x155   : > { %v3077_v10 = vpop.permute.xlu1 %733  ;;  %4592 = vst [vmem:[#allocation30_spill] sm:$0xff] %v3079_v26 }
 0x156   : > { %4591 = vst [vmem:[#allocation29_spill] sm:$0xff] %v3077_v10  ;;  %1119 = vrot.lane.b32.xlu0 %v2867_v48, %s2637_s8  ;;  %v1048_v10 = vmul.f32 0.0, %v2830_v28 }
 0x157   : > { %1086 = vrot.lane.b32.xlu1 %v1054_v27, %s2639_s10 }
 0x158   : > { %v3091_v12 = vpop.permute.xlu0 %482 }
 0x159   : > { %v3089_v18 = vpop.permute.xlu1 %476  ;;  %4595 = vst [vmem:[#allocation33_spill] sm:$0xff] %v3091_v12  ;;  %v3277_v12 = vmul.f32 %v2845_v37, %v2919_v62 }
 0x15a   : > { %4594 = vst [vmem:[#allocation32_spill] sm:$0xff] %v3089_v18  ;;  %1447 = vperm.xlu0 %2509, %v3087_v15  }
 0x15b   : > { %1169 = vperm.xlu1 %2520, %v2699_v2   ;;  %v1050_v2 = vmul.f32 %v2871_v49, %v2895_v58  ;;  %v4604_v49 = vmov 0  }
 0x15c   : > { %v3102_v27 = vpop.permute.xlu0 %660 }
 0x15d   : > { %v3100_v5 = vpop.permute.xlu1 %654  ;;  %4597 = vst [vmem:[#allocation35_spill] sm:$0xff] %v3102_v27  ;;  %v4623_v27 = vmov 4  }
 0x15e   : > { %4596 = vst [vmem:[#allocation34_spill] sm:$0xff] %v3100_v5  ;;  %1435 = vperm.xlu0 %2509, %v3098_v46  }
 0x15f   : > { %1127 = vrot.lane.b32.xlu1 %v2895_v58, %s2637_s8 }
 0x160   : > { %2526 = vset.pattern.permute.xlu1 %v4598_v6  ;;  %v3112_v0 = vpop.permute.xlu0 %741  ;;  %v1046_v6 = vmul.f32 %v2830_v28, %v2867_v48 }
 0x161   : > { %v3110_v44 = vpop.permute.xlu1 %735  ;;  %4600 = vst [vmem:[#allocation37_spill] sm:$0xff] %v3112_v0 }
 0x162   : > { %4599 = vst [vmem:[#allocation36_spill] sm:$0xff] %v3110_v44  ;;  %2528 = vset.pattern.permute.xlu0 %v4601_v30 }
 0x163   : > { %1078 = vrot.lane.b32.xlu1 %v1050_v2, %s2639_s10  ;;  %1907 = vperm.xlu0 %2528, %v3118_v40  }
 0x164   : > { %v3124_v36 = vpop.permute.xlu0 %957 }
 0x165   : > { %v3122_v63 = vpop.permute.xlu1 %870  ;;  %4603 = vst [vmem:[#allocation39_spill] sm:$0xff] %v3124_v36 }
 0x166   : > { %4602 = vst [vmem:[#allocation38_spill] sm:$0xff] %v3122_v63 }
 0x167   : > { %1125 = vrot.lane.b32.xlu1 %v2888_v56, %s2637_s8  ;;  %2539 = vset.pattern.permute.xlu0 %v4604_v49 }
 0x168   : > { %v3131_v2 = vpop.permute.xlu0 %486 }
 0x169   : > { %v3129_v55 = vpop.permute.xlu1 %480 }
 0x16b   : > { %1121 = vrot.lane.b32.xlu1 %v2882_v54, %s2637_s8 }
 0x16c   : > { %v3138_v52 = vpop.permute.xlu0 %607 }
 0x16d   : > { %v3136_v44 = vpop.permute.xlu1 %601  ;;  %4606 = vst [vmem:[#allocation41_spill] sm:$0xff] %v3138_v52 }
 0x16e   : > { %4605 = vst [vmem:[#allocation40_spill] sm:$0xff] %v3136_v44  ;;  %v3156_v44 = vld [vmem:[%s4479_s4 + $0x8] sm:$0xff] }
 0x16f   : > { %1074 = vrot.lane.b32.xlu1 %v1048_v10, %s2639_s10 }
 0x170   : > { %v3143_v36 = vpop.permute.xlu0 %961 }
 0x171   : > { %v3141_v63 = vpop.permute.xlu1 %658  ;;  %4608 = vst [vmem:[#allocation43_spill] sm:$0xff] %v3143_v36  ;;  %v4621_v36 = vmov 3  }
 0x172   : > { %4607 = vst [vmem:[#allocation42_spill] sm:$0xff] %v3141_v63 }
 0x173   : > { %1070 = vrot.lane.b32.xlu1 %v1046_v6, %s2639_s10 }
 0x174   : > { %v3150_v54 = vpop.permute.xlu0 %611 }
 0x175   : > { %v3148_v26 = vpop.permute.xlu1 %739 }
 0x176   : > { %4609 = vst [vmem:[#allocation44_spill] sm:$0xff] %v3148_v26 }
 0x177   : > { %1443 = vperm.xlu1 %2526, %v3118_v40  }
 0x178   : > { %v3160_v22 = vpop.permute.xlu0 %666 }
 0x179   : > { %v3158_v10 = vpop.permute.xlu1 %874 }
 0x17a   : > { %4610 = vst [vmem:[#allocation45_spill] sm:$0xff] %v3158_v10 }
 0x17b   : > { %1439 = vperm.xlu1 %2526, %v3156_v44  }
 0x17c   : > { %v3165_v6 = vpop.permute.xlu0 %747 }
 0x17d   : > { %v3163_v28 = vpop.permute.xlu1 %955  ;;  %4612 = vst [vmem:[#allocation47_spill] sm:$0xff] %v3165_v6 }
 0x17e   : > { %4611 = vst [vmem:[#allocation46_spill] sm:$0xff] %v3163_v28 }
 0x17f   : > { %2527 = vset.pattern.permute.xlu1 %v4601_v30  ;;  %v4617_v30 = vmov 0.0  }
 0x180   : > { %1911 = vperm.xlu1 %2527, %v3087_v15   ;;  %v3171_v47 = vpop.permute.xlu0 %882  ;;  %2530 = vrot.lane.b32.xlu0 %v4617_v30, %s2624_s26 }
 0x181   : > { %v3169_v48 = vpop.permute.xlu1 %605  ;;  %4614 = vst [vmem:[#allocation49_spill] sm:$0xff] %v3171_v47 }
 0x182   : > { %4613 = vst [vmem:[#allocation48_spill] sm:$0xff] %v3169_v48 }
 0x184   : > { %1903 = vperm.xlu1 %2527, %v3156_v44   ;;  %v3176_v10 = vpop.permute.xlu0 %963  ;;  %1415 = vperm.xlu0 %2539, %v3087_v15  }
 0x185   : > { %v3174_v14 = vpop.permute.xlu1 %876  ;;  %4616 = vst [vmem:[#allocation51_spill] sm:$0xff] %v3176_v10 }
 0x186   : > { %4615 = vst [vmem:[#allocation50_spill] sm:$0xff] %v3174_v14 }
 0x188   : > { %1899 = vperm.xlu1 %2527, %v3098_v46   ;;  %v3181_v28 = vpop.permute.xlu0 %492  ;;  %1405 = vperm.xlu0 %2539, %v3156_v44  }
 0x189   : > { %v3179_v5 = vpop.permute.xlu1 %664 }
 0x18c   : > { %2535 = vrot.lane.b32.xlu1 %v4617_v30, %s2624_s26  ;;  %v3189_v42 = vpop.permute.xlu0 %1137  ;;  %1400 = vperm.xlu0 %2539, %v3098_v46  }
 0x18d   : > { %v3187_v9 = vpop.permute.xlu1 %745  ;;  %4618 = vst [vmem:[#allocation52_spill] sm:$0xff] %v3189_v42  ;;  %2540 = vset.pattern.permute.xlu1 %v4604_v49  ;;  %v287_v42 = vlaneseq }
 0x18f   : > { %v288_v63 = vand.u32 127, %v287_v42 }
 0x190   : > { %1410 = vperm.xlu1 %2540, %v3118_v40   ;;  %v673_v50 = vpop.permute.xlu0 %672  ;;  %2542 = vset.pattern.permute.xlu0 %v4621_v36 }
 0x191   : > { %v3194_v14 = vpop.permute.xlu1 %880  ;;  %1663 = vperm.xlu0 %2542, %v3087_v15   ;;  %v289_v18 = vadd.s32 128, %v288_v63  ;;  %v294_v1 = vand.u32 15, %v288_v63 }
 0x192   : > { %4619 = vst [vmem:[#allocation53_spill] sm:$0xff] %v3194_v14 }
 0x193   : > { %v301_v6 = vand.u32 15, %v289_v18  ;;  %vm3250_vm3 = vcmp.ge.s32.totalorder %v294_v1, 1  ;;  %vm3254_vm6 = vcmp.le.s32.totalorder %v294_v1, 14  ;;  %v3268_v18 = vmul.f32 %v2847_v38, %v2888_v56 }
 0x194   : > { %2541 = vset.pattern.permute.xlu1 %v4620_v60  ;;  %v3200_v0 = vpop.permute.xlu0 %753  ;;  %v3273_v1 = vmul.f32 %v2847_v38, %v2895_v58  ;;  %v3290_v38 = vmul.f32 %v2845_v37, %v2943_v8  ;;  %v3295_v58 = vmul.f32 %v2917_v61, %v2968_v32 }
 0x195   : > { %v3198_v26 = vpop.permute.xlu1 %488  ;;  %1583 = vperm.xlu1 %2541, %v3087_v15   ;;  %2544 = vrot.lane.b32.xlu0 %v4617_v30, %s2630_s27  ;;  %vm3258_vm8 = vcmp.ge.s32.totalorder %v301_v6, 1  ;;  %vm3262_vm9 = vcmp.le.s32.totalorder %v301_v6, 14 }
 0x198   : > { %v3206_v29 = vpop.permute.xlu0 %1139 }
 0x199   : > { %v3204_v49 = vpop.permute.xlu1 %613  ;;  %1579 = vperm.xlu1 %2541, %v3118_v40   ;;  %1659 = vperm.xlu0 %2542, %v3118_v40  }
 0x19c   : > { %v3212_v23 = vpop.permute.xlu0 %619 }
 0x19d   : > { %v3210_v10 = vpop.permute.xlu1 %670  ;;  %1575 = vperm.xlu1 %2541, %v3156_v44   ;;  %2549 = vset.pattern.permute.xlu0 %v4620_v60 }
 0x19e   : > { %1571 = vperm.xlu0 %2549, %v3098_v46   ;;  %v682_v6 = vsel %vm674_vm4, %v3210_v10, %v673_v50 }
 0x19f   : > { %v698_v37 = vsel %vm3262_vm9, %v682_v6, 0.0 }
 0x1a0   : > { %v3218_v52 = vpop.permute.xlu0 %1090  ;;  %v722_v50 = vmul.f32 %v2893_v57, %v698_v37  ;;  %v4636_v37 = vunpack.i.l.bf16 %v2816_v21 }
 0x1a1   : > { %v3216_v48 = vpop.permute.xlu1 %751  ;;  %4622 = vst [vmem:[#allocation54_spill] sm:$0xff] %v3218_v52  ;;  %2548 = vset.pattern.permute.xlu1 %v4623_v27  ;;  %v2453_v52 = vunpack.i.h.bf16 %v2816_v21 }
 0x1a2   : > { %1695 = vperm.xlu1 %2548, %v3087_v15   ;;  %v2463_v15 = vunpack.i.h.bf16 %v2880_v53  ;;  %2556 = vset.pattern.permute.xlu0 %v4623_v27  ;;  %v763_v62 = vsel %vm755_vm5, %v3216_v48, %v3200_v0  ;;  %v4634_v0 = vunpack.i.l.bf16 %v2814_v20 }
 0x1a3   : > { %v503_v56 = vsel %vm496_vm2, %v2453_v52, %v3181_v28  ;;  %1691 = vperm.xlu0 %2556, %v3118_v40   ;;  %v779_v6 = vsel %vm3258_vm8, %v763_v62, 0.0 }
 0x1a4   : > { %v3226_v47 = vpop.permute.xlu0 %951 }
 0x1a5   : > { %v3224_v14 = vpop.permute.xlu1 %886  ;;  %4624 = vst [vmem:[#allocation55_spill] sm:$0xff] %v3226_v47 }
 0x1a6   : > { %2555 = vset.pattern.permute.xlu1 %v4621_v36 }
 0x1a7   : > { %2559 = vrot.lane.b32.xlu0 %v4617_v30, %s2630_s27 }
 0x1a8   : > { %v3242_v45 = vpop.permute.xlu0 %1133 }
 0x1a9   : > { %v3240_v41 = vpop.permute.xlu1 %967  ;;  %4625 = vst [vmem:[#allocation56_spill] sm:$0xff] %v3242_v45 }
 0x1ab   : > { %1687 = vperm.xlu0 %2556, %v3156_v44  }
 0x1ac   : > { %v3281_v53 = vpop.permute.xlu0 %1084 }
 0x1ad   : > { %v495_v60 = vpop.permute.xlu1 %494 }
 0x1ae   : > { %v504_v35 = vsel %vm496_vm2, %v3181_v28, %v495_v60  ;;  %v835_v60 = vmul.f32 %v2917_v61, %v2980_v33  ;;  %v2518_v61 = vunpack.i.l.bf16 %v3039_v19  ;;  %v681_v33 = vsel %vm674_vm4, %v2463_v15, %v3210_v10 }
 0x1af   : > { %v520_v52 = vsel %vm3258_vm8, %v504_v35, 0.0  ;;  %v519_v35 = vsel %vm3250_vm3, %v503_v56, 0.0  ;;  %v3331_v15 = vsel %vm496_vm2, %v4634_v0, %v3053_v17  ;;  %v4635_v10 = vunpack.i.h.bf16 %v2814_v20  ;;  %2566 = vrot.lane.b32.xlu0 %v4617_v30, %s2631_s28 }
 0x1b0   : > { %v548_v8 = vmul.f32 %v2822_v24, %v520_v52  ;;  %v3313_v45 = vpop.permute.xlu0 %1131  ;;  %v547_v62 = vmul.f32 %v2822_v24, %v519_v35  ;;  %v697_v0 = vsel %vm3254_vm6, %v681_v33, 0.0  ;;  %v803_v20 = vmul.f32 %v2901_v59, %v779_v6 }
 0x1b1   : > { %v618_v28 = vpop.permute.xlu1 %617  ;;  %v4637_v24 = vunpack.i.l.bf16 %v2930_v4  ;;  %v762_v35 = vsel %vm755_vm5, %v2478_v31, %v3216_v48  ;;  %v680_v31 = vsel %vm674_vm4, %v3179_v5, %v3160_v22  ;;  %v721_v48 = vmul.f32 %v2893_v57, %v697_v0 }
 0x1b2   : > { %v629_v52 = vsel %vm621_vm7, %v618_v28, %v3212_v23  ;;  %v628_v56 = vsel %vm621_vm7, %v3044_v11, %v618_v28  ;;  %v3337_v23 = vsel %vm496_vm2, %v4635_v10, %v3129_v55  ;;  %v502_v11 = vsel %vm496_vm2, %v3131_v2, %v3198_v26 }
 0x1b3   : > { %v645_v32 = vadd.f32 %v629_v52, %v548_v8  ;;  %v501_v8 = vsel %vm496_vm2, %v4636_v37, %v3131_v2  ;;  %v679_v26 = vsel %vm674_vm4, %v4637_v24, %v3179_v5  ;;  %v644_v21 = vadd.f32 %v628_v56, %v547_v62  ;;  %1683 = vperm.xlu0 %2556, %v3098_v46  }
 0x1b4   : > { %v3350_v10 = vpop.permute.xlu0 %1082  ;;  %v4638_v2 = vunpack.i.l.bf16 %v2849_v39  ;;  %v518_v33 = vsel %vm3258_vm8, %v502_v11, 0.0  ;;  %v517_v6 = vsel %vm3250_vm3, %v501_v8, 0.0  ;;  %v695_v62 = vsel %vm3254_vm6, %v679_v26, 0.0 }
 0x1b5   : > { %v730_v28 = vadd.f32 %v722_v50, %v645_v32  ;;  %v889_v52 = vpop.permute.xlu1 %888  ;;  %v4639_v11 = vunpack.i.h.bf16 %v2938_v7  ;;  %v1151_v22 = vsel %vm1143_vm12, %v3206_v29, %v2518_v61  ;;  %v729_v57 = vadd.f32 %v721_v48, %v644_v21 }
 0x1b6   : > { %v900_v37 = vsel %vm892_vm10, %v889_v52, %v4638_v2  ;;  %v546_v2 = vmul.f32 %v2824_v25, %v518_v33  ;;  %v4640_v5 = vunpack.i.l.bf16 %v2857_v43  ;;  %v626_v7 = vsel %vm621_vm7, %v3059_v16, %v3150_v54  ;;  %v4641_v16 = vld [vmem:[#allocation9_spill] sm:$0xff] }
 0x1b7   : > { %v811_v32 = vadd.f32 %v803_v20, %v730_v28  ;;  %v916_v50 = vsel %vm3262_vm9, %v900_v37, 0.0  ;;  %v760_v20 = vsel %vm755_vm5, %v4639_v11, %v3187_v9  ;;  %v778_v28 = vsel %vm3250_vm3, %v762_v35, 0.0  ;;  %v4643_v11 = vld [vmem:[#allocation47_spill] sm:$0xff] }
 0x1b8   : > { %v940_v56 = vmul.f32 %v2957_v13, %v916_v50  ;;  %v3387_v26 = vpop.permute.xlu0 %2522  ;;  %v776_v61 = vsel %vm3250_vm3, %v760_v20, 0.0  ;;  %v802_v21 = vmul.f32 %v2901_v59, %v778_v28  ;;  %v899_v33 = vsel %vm892_vm10, %v3224_v14, %v889_v52  ;;  %v4644_v52 = vld [vmem:[#allocation5_spill] sm:$0xff] }
 0x1b9   : > { %v970_v8 = vpop.permute.xlu1 %969  ;;  %v843_v24 = vadd.f32 %v835_v60, %v811_v32  ;;  %v627_v60 = vsel %vm621_vm7, %v3150_v54, %v3204_v49  ;;  %v545_v50 = vmul.f32 %v2824_v25, %v517_v6  ;;  %v696_v54 = vsel %vm3262_vm9, %v680_v31, 0.0  ;;  %v4642_v49 = vld [vmem:[#allocation6_spill] sm:$0xff]  ;;  %v4645_v6 = vld [vmem:[#allocation27_spill] sm:$0xff] }
 0x1ba   : > { %v981_v0 = vsel %vm973_vm11, %v970_v8, %v4640_v5  ;;  %v719_v48 = vmul.f32 %v4642_v49, %v695_v62  ;;  %v761_v20 = vsel %vm755_vm5, %v3187_v9, %v4643_v11  ;;  %v643_v59 = vadd.f32 %v627_v60, %v546_v2  ;;  %v4646_v31 = vld [vmem:[#allocation54_spill] sm:$0xff]  ;;  %v4648_v60 = vld [vmem:[#allocation33_spill] sm:$0xff] }
 0x1bb   : > { %v997_v35 = vsel %vm3258_vm8, %v981_v0, 0.0  ;;  %v948_v37 = vadd.f32 %v940_v56, %v843_v24  ;;  %v1167_v56 = vsel %vm3262_vm9, %v1151_v22, 0.0  ;;  %v810_v28 = vadd.f32 %v802_v21, %v729_v57  ;;  %v4647_v0 = vld [vmem:[#allocation12_spill] sm:$0xff]  ;;  %v4649_v21 = vld [vmem:[#allocation49_spill] sm:$0xff] }
 0x1bc   : > { %v1021_v32 = vmul.f32 %v4641_v16, %v997_v35  ;;  %v642_v14 = vadd.f32 %v626_v7, %v545_v50  ;;  %v800_v5 = vmul.f32 %v4644_v52, %v776_v61  ;;  %v915_v25 = vsel %vm3254_vm6, %v899_v33, 0.0  ;;  %v3424_v2 = vpop.permute.xlu0 %1080  ;;  %v4650_v33 = vld [vmem:[#allocation53_spill] sm:$0xff] }
 0x1bd   : > { %v1102_v62 = vsel %vm1094_vm13, %v4646_v31, %v4645_v6  ;;  %v720_v22 = vmul.f32 %v4642_v49, %v696_v54  ;;  %v980_v9 = vsel %vm973_vm11, %v3240_v41, %v970_v8  ;;  %v1191_v7 = vmul.f32 %v4647_v0, %v1167_v56  ;;  %v4651_v49 = vld [vmem:[#allocation32_spill] sm:$0xff]  ;;  %v4657_v6 = vld [vmem:[#allocation41_spill] sm:$0xff] }
 0x1be   : > { %v1029_v24 = vadd.f32 %v1021_v32, %v948_v37  ;;  %v500_v35 = vsel %vm496_vm2, %v3129_v55, %v4648_v60  ;;  %v727_v37 = vadd.f32 %v719_v48, %v642_v14  ;;  %v777_v61 = vsel %vm3258_vm8, %v761_v20, 0.0 }
 0x1bf   : > { %v897_v32 = vsel %vm892_vm10, %v4650_v33, %v4649_v21  ;;  %v728_v50 = vadd.f32 %v720_v22, %v643_v59  ;;  %v939_v41 = vmul.f32 %v2957_v13, %v915_v25  ;;  %v842_v54 = vadd.f32 %v3295_v58, %v810_v28  ;;  %v4653_v28 = vld [vmem:[#allocation31_spill] sm:$0xff]  ;;  %v4661_v33 = vld [vmem:[#allocation4_spill] sm:$0xff] }
 0x1c0   : > { %v1118_v57 = vadd.f32 %v1102_v62, %v1029_v24  ;;  %v3440_v56 = vsel %vm496_vm2, %v3053_v17, %v4651_v49  ;;  %v515_v55 = vsel %vm3250_vm3, %v3337_v23, 0.0  ;;  %v808_v48 = vadd.f32 %v800_v5, %v727_v37  ;;  %v4654_v24 = vld [vmem:[#allocation42_spill] sm:$0xff]  ;;  %v4656_v5 = vld [vmem:[#allocation35_spill] sm:$0xff]  ;;  %v4658_v62 = vld [vmem:[#allocation48_spill] sm:$0xff] }
 0x1c1   : > { %v996_v11 = vsel %vm3250_vm3, %v980_v9, 0.0  ;;  %v4652_v20 = vmov 6   ;;  %v516_v13 = vsel %vm3258_vm8, %v500_v35, 0.0  ;;  %v801_v58 = vmul.f32 %v4644_v52, %v777_v61  ;;  %v3472_v35 = vpop.permute.xlu0 %1076 }
 0x1c2   : > { %v1199_v8 = vadd.f32 %v1191_v7, %v1118_v57  ;;  %2575 = vset.pattern.permute.xlu0 %v4652_v20  ;;  %v913_v59 = vsel %vm3254_vm6, %v897_v32, 0.0  ;;  %v4655_v23 = vunpack.i.h.bf16 %v2930_v4  ;;  %v678_v25 = vsel %vm674_vm4, %v4654_v24, %v4656_v5  ;;  %v4660_v7 = vld [vmem:[#allocation52_spill] sm:$0xff] }
 0x1c3   : > { %1879 = vperm.xlu0 %2575, %v4653_v28   ;;  %v625_v22 = vsel %vm621_vm7, %v4658_v62, %v4657_v6  ;;  %v4659_v52 = vunpack.i.h.bf16 %v2849_v39  ;;  %v809_v57 = vadd.f32 %v801_v58, %v728_v50  ;;  %v1150_v4 = vsel %vm1143_vm12, %v4660_v7, %v3206_v29  ;;  %v4663_v39 = vld [vmem:[#allocation43_spill] sm:$0xff]  ;;  %v4664_v50 = vld [vmem:[#allocation20_spill] sm:$0xff] }
 0x1c4   : > { %v1207_v17 = vmax.f32 %v1199_v8, 0.0  ;;  %v677_v14 = vsel %vm674_vm4, %v4655_v23, %v4654_v24  ;;  %v1020_v60 = vmul.f32 %v4641_v16, %v996_v11  ;;  %v947_v61 = vadd.f32 %v939_v41, %v842_v54  ;;  %v4662_v8 = vld [vmem:[#allocation51_spill] sm:$0xff]  ;;  %v4665_v41 = vld [vmem:[#allocation37_spill] sm:$0xff]  ;;  %v4666_v54 = vld [vmem:[#allocation44_spill] sm:$0xff] }
 0x1c5   : > { %v898_v9 = vsel %vm892_vm10, %v4649_v21, %v4659_v52  ;;  %v544_v32 = vmul.f32 %v4661_v33, %v516_v13  ;;  %v978_v49 = vsel %vm973_vm11, %v4663_v39, %v4662_v8  ;;  %v840_v21 = vadd.f32 %v3277_v12, %v808_v48 }
 0x1c6   : > { %v3474_v37 = vpop.permute.xlu1 %1173  ;;  %1253 = vmatprep.subr.mxu1 %v1207_v17  ;;  %v937_v58 = vmul.f32 %v4664_v50, %v913_v59  ;;  %v514_v29 = vsel %vm3258_vm8, %v3440_v56, 0.0  ;;  %v543_v16 = vmul.f32 %v4661_v33, %v515_v55  ;;  %v694_v11 = vsel %vm3262_vm9, %v678_v25, 0.0  ;;  %v3514_v33 = vpop.permute.xlu0 %1072 }
 0x1c7   : > { %v759_v13 = vsel %vm755_vm5, %v4666_v54, %v4665_v41  ;;  %1875 = vperm.xlu0 %2575, %v3118_v40   ;;  %v693_v12 = vsel %vm3254_vm6, %v677_v14, 0.0  ;;  %v641_v48 = vadd.f32 %v625_v22, %v544_v32  ;;  %v914_v59 = vsel %vm3262_vm9, %v898_v9, 0.0  ;;  %v4668_v14 = vld [vmem:[#allocation17_spill] sm:$0xff] }
 0x1c8   : > { %v1166_v56 = vsel %vm3254_vm6, %v1150_v4, 0.0  ;;  %v4667_v55 = vunpack.i.h.bf16 %v2857_v43  ;;  %v994_v24 = vsel %vm3250_vm3, %v978_v49, 0.0  ;;  %v1028_v23 = vadd.f32 %v1020_v60, %v947_v61  ;;  %v4669_v43 = vld [vmem:[#allocation24_spill] sm:$0xff] }
 0x1c9   : > { %v841_v25 = vadd.f32 %v3290_v38, %v809_v57  ;;  %v718_v6 = vmul.f32 %v4668_v14, %v694_v11  ;;  %v775_v22 = vsel %vm3258_vm8, %v759_v13, 0.0  ;;  %v945_v52 = vadd.f32 %v937_v58, %v840_v21  ;;  %v4675_v13 = vld [vmem:[#allocation18_spill] sm:$0xff] }
 0x1ca   : > { %v979_v17 = vsel %vm973_vm11, %v4662_v8, %v4667_v55  ;;  %v1089_v5 = vpop.permute.xlu1 %1088  ;;  %v624_v7 = vsel %vm621_vm7, %v4669_v43, %v4658_v62  ;;  %v938_v4 = vmul.f32 %v4664_v50, %v914_v59  ;;  %v1190_v38 = vmul.f32 %v4647_v0, %v1166_v56  ;;  %v4671_v8 = vld [vmem:[#allocation10_spill] sm:$0xff] }
 0x1cb   : > { %v1101_v9 = vsel %vm1094_vm13, %v1089_v5, %v4646_v31  ;;  %v4670_v57 = vmov 8   ;;  %v726_v61 = vadd.f32 %v718_v6, %v641_v48  ;;  %v995_v32 = vsel %vm3258_vm8, %v979_v17, 0.0  ;;  %v4672_v31 = vld [vmem:[#allocation56_spill] sm:$0xff]  ;;  %v4677_v55 = vld [vmem:[#allocation50_spill] sm:$0xff] }
 0x1cc   : > { %v1117_v60 = vadd.f32 %v1101_v9, %v1028_v23  ;;  %2582 = vset.pattern.permute.xlu0 %v4670_v57  ;;  %v1018_v39 = vmul.f32 %v4671_v8, %v994_v24  ;;  %v1148_v49 = vsel %vm1143_vm12, %v3313_v45, %v4672_v31  ;;  %v4673_v62 = vunpack.i.h.bf16 %v3039_v19  ;;  %v4678_v5 = vld [vmem:[#allocation34_spill] sm:$0xff] }
 0x1cd   : > { %2047 = vperm.xlu0 %2582, %v4653_v28   ;;  %v1099_v0 = vsel %vm1094_vm13, %v3350_v10, %v3281_v53  ;;  %v946_v58 = vadd.f32 %v938_v4, %v841_v25  ;;  %v4674_v41 = vunpack.i.l.bf16 %v2986_v34  ;;  %v799_v48 = vmul.f32 %v4675_v13, %v775_v22  ;;  %v4679_v25 = vld [vmem:[#allocation26_spill] sm:$0xff] }
 0x1ce   : > { %v1149_v21 = vsel %vm1143_vm12, %v4672_v31, %v4673_v62  ;;  %v3532_v50 = vpop.permute.xlu1 %949  ;;  %v1198_v11 = vadd.f32 %v1190_v38, %v1117_v60  ;;  %v640_v59 = vadd.f32 %v624_v7, %v543_v16  ;;  %v1026_v19 = vadd.f32 %v1018_v39, %v945_v52  ;;  %v3558_v7 = vpop.permute.xlu0 %1119  ;;  %v4680_v38 = vld [vmem:[#allocation13_spill] sm:$0xff]  ;;  %v4681_v39 = vld [vmem:[#allocation3_spill] sm:$0xff]  ;;  %v4682_v62 = vld [vmem:[#allocation40_spill] sm:$0xff] }
 0x1cf   : > { %v758_v45 = vsel %vm755_vm5, %v4674_v41, %v4666_v54  ;;  %v4676_v56 = vunpack.i.l.bf16 %v3011_v3  ;;  %v1019_v10 = vmul.f32 %v4671_v8, %v995_v32  ;;  %v1164_v24 = vsel %vm3254_vm6, %v1148_v49, 0.0 }
 0x1d0   : > { %v1206_v23 = vmax.f32 %v1198_v11, 0.0  ;;  %v676_v6 = vsel %vm674_vm4, %v4679_v25, %v4678_v5  ;;  %v717_v54 = vmul.f32 %v4668_v14, %v693_v12  ;;  %v1165_v16 = vsel %vm3262_vm9, %v1149_v21, 0.0  ;;  %v4683_v21 = vld [vmem:[#allocation30_spill] sm:$0xff]  ;;  %v4684_v11 = vld [vmem:[#allocation45_spill] sm:$0xff] }
 0x1d1   : > { %v896_v17 = vsel %vm892_vm10, %v4677_v55, %v4676_v56  ;;  %v1115_v22 = vadd.f32 %v1099_v0, %v1026_v19  ;;  %2043 = vperm.xlu0 %2582, %v3118_v40   ;;  %v513_v52 = vsel %vm3250_vm3, %v3331_v15, 0.0  ;;  %v774_v9 = vsel %vm3250_vm3, %v758_v45, 0.0  ;;  %v4688_v56 = vld [vmem:[#allocation21_spill] sm:$0xff] }
 0x1d2   : > { %v807_v43 = vadd.f32 %v799_v48, %v726_v61  ;;  %v1027_v4 = vadd.f32 %v1019_v10, %v946_v58  ;;  %v1087_v60 = vpop.permute.xlu1 %1086  ;;  %1254 = vmatpush1.msra.mxu1 %v1206_v23  ;;  %v725_v12 = vadd.f32 %v717_v54, %v640_v59  ;;  %v912_v14 = vsel %vm3262_vm9, %v896_v17, 0.0  ;;  %v4687_v48 = vld [vmem:[#allocation39_spill] sm:$0xff]  ;;  %v4689_v23 = vld [vmem:[#allocation36_spill] sm:$0xff]  ;;  %v4690_v5 = vld [vmem:[#allocation29_spill] sm:$0xff] }
 0x1d3   : > { %v1188_v32 = vmul.f32 %v4680_v38, %v1164_v24  ;;  %v1100_v8 = vsel %vm1094_vm13, %v3281_v53, %v1087_v60  ;;  %v542_v15 = vmul.f32 %v4681_v39, %v514_v29  ;;  %v692_v31 = vsel %vm3262_vm9, %v676_v6, 0.0 }
 0x1d4   : > { %v1189_v61 = vmul.f32 %v4680_v38, %v1165_v16  ;;  %v1116_v49 = vadd.f32 %v1100_v8, %v1027_v4  ;;  %v623_v0 = vsel %vm621_vm7, %v4683_v21, %v4682_v62  ;;  %v798_v58 = vmul.f32 %v4675_v13, %v774_v9  ;;  %v4694_v8 = vld [vmem:[#allocation25_spill] sm:$0xff] }
 0x1d5   : > { %v895_v41 = vsel %vm892_vm10, %v4684_v11, %v4677_v55  ;;  %v1196_v45 = vadd.f32 %v1188_v32, %v1115_v22  ;;  %v4685_v53 = vmov 1   ;;  %v4686_v29 = vunpack.i.l.bf16 %v3028_v51  ;;  %v3585_v24 = vpop.permute.xlu0 %1447  ;;  %v4691_v22 = vld [vmem:[#allocation15_spill] sm:$0xff]  ;;  %2600 = vrot.lane.b32.xlu0 %v4617_v30, %s2637_s8 }
 0x1d6   : > { %2604 = vset.pattern.permute.xlu0 %v4685_v53  ;;  %v839_v19 = vadd.f32 %v3273_v1, %v807_v43  ;;  %v936_v17 = vmul.f32 %v4688_v56, %v912_v14  ;;  %v3583_v10 = vpop.permute.xlu1 %1169  ;;  %v1197_v13 = vadd.f32 %v1189_v61, %v1116_v49  ;;  %v757_v55 = vsel %vm755_vm5, %v4690_v5, %v4689_v23  ;;  %v4697_v53 = vld [vmem:[#allocation22_spill] sm:$0xff] }
 0x1d7   : > { %v977_v59 = vsel %vm973_vm11, %v4687_v48, %v4686_v29  ;;  %v806_v6 = vadd.f32 %v798_v58, %v725_v12  ;;  %v2524_v54 = vunpack.i.l.bf16 %v3387_v26  ;;  %v1459_v16 = vmul.f32 0.0, %v3585_v24 }
 0x1d8   : > { %v4692_v9 = vunpack.i.l.bf16 %v4691_v22  ;;  %v639_v43 = vadd.f32 %v623_v0, %v542_v15  ;;  %v911_v4 = vsel %vm3254_vm6, %v895_v41, 0.0  ;;  %v1205_v60 = vmax.f32 %v1197_v13, 0.0  ;;  %v4695_v15 = vld [vmem:[#allocation7_spill] sm:$0xff] }
 0x1d9   : > { %v4693_v14 = vunpack.i.h.bf16 %v2986_v34  ;;  %v993_v12 = vsel %vm3258_vm8, %v977_v59, 0.0  ;;  %1492 = vrot.lane.b32.xlu1 %v1459_v16, %s2638_s9  ;;  %v1204_v32 = vmax.f32 %v1196_v45, 0.0  ;;  %v716_v61 = vmul.f32 %v4695_v15, %v692_v31  ;;  %v4696_v34 = vld [vmem:[#allocation46_spill] sm:$0xff]  ;;  %v4700_v22 = vld [vmem:[#allocation55_spill] sm:$0xff] }
 0x1da   : > { %v675_v1 = vsel %vm674_vm4, %v4692_v9, %v4679_v25  ;;  %v622_v25 = vsel %vm621_vm7, %v4694_v8, %v4683_v21  ;;  %v773_v49 = vsel %vm3258_vm8, %v757_v55, 0.0  ;;  %v944_v62 = vadd.f32 %v936_v17, %v839_v19  ;;  %v1128_v0 = vpop.permute.xlu1 %1127  ;;  %1255 = vmatprep.subr.mxu1 %v1205_v60  ;;  %v4703_v8 = vld [vmem:[#allocation28_spill] sm:$0xff] }
 0x1db   : > { %v756_v38 = vsel %vm755_vm5, %v4693_v14, %v4690_v5  ;;  %v976_v58 = vsel %vm973_vm11, %v4696_v34, %v4687_v48  ;;  %v838_v11 = vadd.f32 %v3268_v18, %v806_v6  ;;  %v935_v41 = vmul.f32 %v4688_v56, %v911_v4  ;;  %1256 = vmatpush1.msra.mxu1 %v1204_v32  ;;  %v4701_v14 = vld [vmem:[#allocation16_spill] sm:$0xff] }
 0x1dc   : > { %v1147_v45 = vsel %vm1143_vm12, %v1128_v0, %v2524_v54  ;;  %v541_v21 = vmul.f32 %v4681_v39, %v513_v52  ;;  %v691_v31 = vsel %vm3254_vm6, %v675_v1, 0.0  ;;  %v1017_v29 = vmul.f32 %v4697_v53, %v993_v12  ;;  %v4698_v39 = vld [vmem:[#allocation19_spill] sm:$0xff] }
 0x1dd   : > { %v724_v59 = vadd.f32 %v716_v61, %v639_v43  ;;  %v2508_v19 = vunpack.i.h.bf16 %v3011_v3  ;;  %v2514_v17 = vunpack.i.h.bf16 %v3028_v51  ;;  %v772_v18 = vsel %vm3250_vm3, %v756_v38, 0.0  ;;  %2551 = vrot.lane.b32.xlu1 %v4617_v30, %s2635_s30  ;;  %v4699_v51 = vld [vmem:[#allocation38_spill] sm:$0xff]  ;;  %v4702_v38 = vld [vmem:[#allocation8_spill] sm:$0xff] }
 0x1de   : > { %v1163_v48 = vsel %vm3262_vm9, %v1147_v45, 0.0  ;;  %v638_v52 = vadd.f32 %v622_v25, %v541_v21  ;;  %v797_v56 = vmul.f32 %v4698_v39, %v773_v49  ;;  %v992_v13 = vsel %vm3250_vm3, %v976_v58, 0.0  ;;  %v1079_v5 = vpop.permute.xlu1 %1078 }
 0x1df   : > { %v1025_v23 = vadd.f32 %v1017_v29, %v944_v62  ;;  %v715_v3 = vmul.f32 %v4695_v15, %v691_v31  ;;  %v894_v55 = vsel %vm892_vm10, %v4699_v51, %v2508_v19  ;;  %v943_v6 = vadd.f32 %v935_v41, %v838_v11  ;;  %v4705_v19 = vld [vmem:[#allocation11_spill] sm:$0xff] }
 0x1e0   : > { %v1098_v54 = vsel %vm1094_vm13, %v1079_v5, %v3424_v2  ;;  %v805_v16 = vadd.f32 %v797_v56, %v724_v59  ;;  %v975_v9 = vsel %vm973_vm11, %v4700_v22, %v2514_v17  ;;  %v1187_v1 = vmul.f32 %v3474_v37, %v1163_v48 }
 0x1e1   : > { %v1114_v43 = vadd.f32 %v1098_v54, %v1025_v23  ;;  %v796_v4 = vmul.f32 %v4698_v39, %v772_v18  ;;  %v1016_v60 = vmul.f32 %v4697_v53, %v992_v13  ;;  %v829_v12 = vmul.f32 %v4702_v38, %v4701_v14  ;;  %1655 = vperm.xlu1 %2555, %v3156_v44   ;;  %v4706_v18 = vld [vmem:[#allocation23_spill] sm:$0xff]  ;;  %v4707_v13 = vld [vmem:[#allocation14_spill] sm:$0xff] }
 0x1e2   : > { %v723_v32 = vadd.f32 %v715_v3, %v638_v52  ;;  %v893_v2 = vsel %vm892_vm10, %v4703_v8, %v4699_v51  ;;  %v1097_v25 = vsel %vm1094_vm13, %v3472_v35, %v1079_v5  ;;  %v1126_v15 = vpop.permute.xlu1 %1125  ;;  %v910_v49 = vsel %vm3262_vm9, %v894_v55, 0.0 }
 0x1e3   : > { %v1195_v61 = vadd.f32 %v1187_v1, %v1114_v43  ;;  %v991_v62 = vsel %vm3258_vm8, %v975_v9, 0.0  ;;  %v1024_v34 = vadd.f32 %v1016_v60, %v943_v6  ;;  %v1146_v58 = vsel %vm1143_vm12, %v1126_v15, %v1128_v0 }
 0x1e4   : > { %v974_v11 = vsel %vm973_vm11, %v3532_v50, %v4700_v22  ;;  %v1162_v41 = vsel %vm3254_vm6, %v1146_v58, 0.0  ;;  %v837_v35 = vadd.f32 %v829_v12, %v805_v16  ;;  %v909_v21 = vsel %vm3254_vm6, %v893_v2, 0.0  ;;  %v1211_v58 = vld [vmem:[%s4478_s3 + $0x18] sm:$0xff] }
 0x1e5   : > { %v1203_v45 = vmax.f32 %v1195_v61, 0.0  ;;  %v2525_v31 = vunpack.i.h.bf16 %v3387_v26  ;;  %v1113_v53 = vadd.f32 %v1097_v25, %v1024_v34  ;;  %v1186_v29 = vmul.f32 %v3474_v37, %v1162_v41 }
 0x1e6   : > { %v4704_v59 = vmov 5   ;;  %v804_v0 = vadd.f32 %v796_v4, %v723_v32  ;;  %v934_v17 = vmul.f32 %v4705_v19, %v910_v49  ;;  %v1015_v50 = vmul.f32 %v4706_v18, %v991_v62  ;;  %v1122_v48 = vpop.permute.xlu1 %1121  ;;  %v1208_v49 = vld [vmem:[%s4478_s3] sm:$0xff]  ;;  %v1210_v62 = vld [vmem:[%s4478_s3 + $0x10] sm:$0xff] }
 0x1e7   : > { %2557 = vset.pattern.permute.xlu1 %v4704_v59  ;;  %1257 = vmatprep.subr.mxu1 %v1203_v45  ;;  %v990_v52 = vsel %vm3250_vm3, %v974_v11, 0.0  ;;  %v1145_v39 = vsel %vm1143_vm12, %v1122_v48, %v2525_v31  ;;  %v1194_v26 = vadd.f32 %v1186_v29, %v1113_v53  ;;  %v933_v56 = vmul.f32 %v4705_v19, %v909_v21  ;;  %v1436_v11 = vpop.permute.xlu0 %1435 }
 0x1e8   : > { %1799 = vperm.xlu1 %2557, %v4653_v28   ;;  %v942_v37 = vadd.f32 %v934_v17, %v837_v35  ;;  %v828_v23 = vmul.f32 %v4702_v38, %v4707_v13  ;;  %v1161_v5 = vsel %vm3262_vm9, %v1145_v39, 0.0  ;;  %v1014_v51 = vmul.f32 %v4706_v18, %v990_v52 }
 0x1e9   : > { %v1202_v3 = vmax.f32 %v1194_v26, 0.0  ;;  %v1144_v28 = vsel %vm1143_vm12, %v3558_v7, %v1122_v48  ;;  %v4708_v16 = vmov 3   ;;  %v1185_v9 = vmul.f32 %v3583_v10, %v1161_v5 }
 0x1ea   : > { %v1075_v55 = vpop.permute.xlu1 %1074  ;;  %v1023_v6 = vadd.f32 %v1015_v50, %v942_v37  ;;  %v836_v54 = vadd.f32 %v828_v23, %v804_v0  ;;  %v1160_v4 = vsel %vm3254_vm6, %v1144_v28, 0.0  ;;  %v4709_v31 = vmov 7  }
 0x1eb   : > { %v1096_v22 = vsel %vm1094_vm13, %v3514_v33, %v1075_v55  ;;  %1258 = vmatpush1.msra.mxu1 %v1202_v3  ;;  %v1184_v12 = vmul.f32 %v3583_v10, %v1160_v4  ;;  %v3741_v35 = vpop.permute.xlu0 %1907 }
 0x1ec   : > { %2563 = vset.pattern.permute.xlu1 %v4708_v16  ;;  %v1112_v1 = vadd.f32 %v1096_v22, %v1023_v6  ;;  %v941_v43 = vadd.f32 %v933_v56, %v836_v54  ;;  %v1922_v21 = vmul.f32 0.0, %v3741_v35 }
 0x1ee   : > { %v1071_v60 = vpop.permute.xlu1 %1070  ;;  %v1022_v14 = vadd.f32 %v1014_v51, %v941_v43  ;;  %v1193_v38 = vadd.f32 %v1185_v9, %v1112_v1 }
 0x1ef   : > { %v1095_v7 = vsel %vm1094_vm13, %v1071_v60, %v3514_v33  ;;  %v1209_v33 = vld [vmem:[%s4478_s3 + $0x8] sm:$0xff] }
 0x1f0   : > { %v1111_v32 = vadd.f32 %v1095_v7, %v1022_v14  ;;  %v1201_v8 = vmax.f32 %v1193_v38, 0.0 }
 0x1f2   : > { %v3688_v2 = vpop.permute.xlu1 %1443  ;;  %1259 = vmatprep.subr.mxu1 %v1201_v8  ;;  %v1192_v25 = vadd.f32 %v1184_v12, %v1111_v32  ;;  %v3788_v37 = vpop.permute.xlu0 %2530 }
 0x1f3   : > { %v1456_v15 = vmul.f32 0.0, %v3688_v2 }
 0x1f4   : > { %v1200_v61 = vmax.f32 %v1192_v25, 0.0 }
 0x1f5   : > { %1486 = vrot.lane.b32.xlu1 %v1456_v15, %s2638_s9 }
 0x1f6   : > { %1260 = vmatpush1.msra.mxu1 %v1200_v61  ;;  %v3702_v10 = vpop.permute.xlu1 %1439 }
 0x1f7   : > { %2409 = vmatmul.mubr.msk.f32.vlgmr.msra.gmra.mxu1 %vm1216_vm14, %v1208_v49  ;;  %v1453_v34 = vmul.f32 0.0, %v3702_v10 }
 0x1f8   : > { %1299 = vmatprep.mubr.f32.mxu1 %v4617_v30 }
 0x1f9   : > { %1651 = vperm.xlu1 %2563, %v3098_v46  }
 0x1fb   : > { %2410 = vmatmul.mubr.msk.f32.gmra.mxu1 %vm1216_vm14, %v1209_v33  ;;  %v3735_v41 = vpop.permute.xlu1 %1911 }
 0x1fc   : > { %1305 = vmatprep.mubr.f32.mxu1 %v4617_v30  ;;  %v1925_v45 = vmul.f32 0.0, %v3735_v41 }
 0x1fd   : > { %2564 = vset.pattern.permute.xlu1 %v4704_v59 }
 0x1fe   : > { %1795 = vperm.xlu1 %2564, %v3118_v40   ;;  %v1450_v40 = vmul.f32 0.0, %v1436_v11 }
 0x1ff   : > { %2411 = vmatmul.mubr.msk.f32.gmra.mxu1 %vm1216_vm14, %v1210_v62  ;;  %v3748_v53 = vpop.permute.xlu1 %1903  ;;  %v3797_v5 = vpop.permute.xlu0 %1415 }
 0x200   : > { %1311 = vmatprep.mubr.f32.mxu1 %v4617_v30  ;;  %4714 = vst [vmem:[#allocation27_spill] sm:$0xff] %v3797_v5 }
 0x202   : > { %1480 = vrot.lane.b32.xlu1 %v1453_v34, %s2638_s9 }
 0x203   : > { %2412 = vmatmul.mubr.msk.f32.gmra.mxu1 %vm1216_vm14, %v1211_v58  ;;  %v3750_v29 = vpop.permute.xlu1 %1899  ;;  %v3810_v28 = vpop.permute.xlu0 %1405 }
 0x206   : > { %2571 = vrot.lane.b32.xlu1 %v4617_v30, %s2635_s30 }
 0x207   : > { %v3752_v0 = vpop.permute.xlu1 %2535  ;;  %v3820_v22 = vpop.permute.xlu0 %1400 }
 0x20a   : > { %1791 = vperm.xlu1 %2564, %v3156_v44  }
 0x20b   : > { %v3754_v19 = vpop.permute.xlu1 %1410 }
 0x20c   : > { %v3833_v43 = vpop.permute.xlu0 %1663 }
 0x20d   : > { %4716 = vst [vmem:[#allocation12_spill] sm:$0xff] %v3833_v43 }
 0x20e   : > { %1474 = vrot.lane.b32.xlu1 %v1450_v40, %s2638_s9 }
 0x210   : > { %v3756_v17 = vpop.permute.xlu1 %1583  ;;  %v3841_v60 = vpop.permute.xlu0 %2544 }
 0x211   : > { %4710 = vst [vmem:[#allocation9_spill] sm:$0xff] %v3756_v17 }
 0x212   : > { %2577 = vrot.lane.b32.xlu1 %v4617_v30, %s2633_s29 }
 0x214   : > { %v3758_v18 = vpop.permute.xlu1 %1579  ;;  %v3855_v7 = vpop.permute.xlu0 %1659 }
 0x216   : > { %1787 = vperm.xlu1 %2564, %v3098_v46  }
 0x218   : > { %v3760_v50 = vpop.permute.xlu1 %1575 }
 0x219   : > { %v3865_v8 = vpop.permute.xlu0 %1571 }
 0x21a   : > { %2581 = vset.pattern.permute.xlu1 %v4652_v20 }
 0x21b   : > { %1871 = vperm.xlu1 %2581, %v3156_v44  }
 0x21e   : > { %v3878_v61 = vpop.permute.xlu0 %1691 }
 0x21f   : > { %2584 = vrot.lane.b32.xlu1 %v4617_v30, %s2631_s28  ;;  %4720 = vst [vmem:[#allocation32_spill] sm:$0xff] %v3878_v61 }
 0x223   : > { %1867 = vperm.xlu1 %2581, %v3098_v46  }
 0x227   : > { %2589 = vrot.lane.b32.xlu1 %v4617_v30, %s2633_s29 }
 0x228   : > { %2598 = vset.pattern.permute.xlu1 %v4670_v57 }
 0x22b   : > { %2594 = vrot.lane.b32.xlu1 %v4617_v30, %s2637_s8 }
 0x22f   : > { %1960 = vrot.lane.b32.xlu1 %v1925_v45, %s2639_s10 }
 0x233   : > { %2039 = vperm.xlu1 %2598, %v3156_v44   ;;  %v3762_v44 = vpop.permute.xlu1 %1695 }
 0x234   : > { %4711 = vst [vmem:[#allocation6_spill] sm:$0xff] %v3762_v44 }
 0x237   : > { %1954 = vrot.lane.b32.xlu1 %v1922_v21, %s2639_s10 }
 0x23b   : > { %2035 = vperm.xlu1 %2598, %v3098_v46  }
 0x23f   : > { %2605 = vset.pattern.permute.xlu1 %v4709_v31 }
 0x24b   : > { %v3764_v48 = vpop.permute.xlu1 %1492 }
 0x24c   : > { %4712 = vst [vmem:[#allocation47_spill] sm:$0xff] %v3764_v48 }
 0x24f   : > { %v3766_v46 = vpop.permute.xlu1 %2551 }
 0x25c   : > { %v3770_v39 = vpop.permute.xlu1 %1655 }
 0x263   : > { %v3782_v56 = vpop.permute.xlu1 %1799 }
 0x264   : > { %4713 = vst [vmem:[#allocation5_spill] sm:$0xff] %v3782_v56 }
 0x267   : > { %v3790_v13 = vpop.permute.xlu1 %1486 }
 0x274   : > { %v3802_v3 = vpop.permute.xlu1 %1651 }
 0x279   : > { %v3813_v6 = vpop.permute.xlu1 %1795 }
 0x27a   : > { %4715 = vst [vmem:[#allocation54_spill] sm:$0xff] %v3813_v6 }
 0x27d   : > { %v3826_v9 = vpop.permute.xlu1 %1480 }
 0x281   : > { %v3835_v4 = vpop.permute.xlu1 %2571 }
 0x285   : > { %v3847_v14 = vpop.permute.xlu1 %1791 }
 0x289   : > { %v3857_v12 = vpop.permute.xlu1 %1474 }
 0x28d   : > { %v3867_v25 = vpop.permute.xlu1 %2577 }
 0x28e   : > { %4718 = vst [vmem:[#allocation49_spill] sm:$0xff] %v3867_v25 }
 0x291   : > { %v3880_v49 = vpop.permute.xlu1 %1787 }
 0x296   : > { %v3886_v33 = vpop.permute.xlu1 %1871 }
 0x29a   : > { %v3899_v34 = vpop.permute.xlu1 %2584 }
 0x29e   : > { %v3911_v45 = vpop.permute.xlu1 %1867 }
 0x2b7   : > { %v3768_v52 = vpop.f32.mrf.mxu1 }
 0x2b8   : > { %1738 = vrot.lane.b32.xlu0 %v3768_v52, %s2631_s28  ;;  %1352 = vrot.lane.b32.xlu1 %v3768_v52, %s2624_s26  ;;  %v1451_v23 = vmul.f32 %v1436_v11, %v3768_v52  ;;  %v1914_v5 = vmul.f32 %v3750_v29, %v3768_v52 }
 0x2b9   : > { %v3776_v26 = vpop.f32.mrf.mxu1 }
 0x2ba   : > { %v1452_v55 = vmul.f32 %v1436_v11, %v3776_v26 }
 0x2bb   : > { %v3804_v51 = vpop.f32.mrf.mxu1 }
 0x2bc   : > { %1524 = vrot.lane.b32.xlu1 %v3768_v52, %s2630_s27  ;;  %1354 = vrot.lane.b32.xlu0 %v3776_v26, %s2624_s26  ;;  %v1454_v1 = vmul.f32 %v3702_v10, %v3804_v51  ;;  %v1917_v6 = vmul.f32 %v3748_v53, %v3804_v51 }
 0x2bd   : > { %v3818_v54 = vpop.f32.mrf.mxu1 }
 0x2be   : > { %v1455_v32 = vmul.f32 %v3702_v10, %v3818_v54  ;;  %v3888_v10 = vpop.permute.xlu0 %2559 }
 0x2bf   : > { %v3849_v38 = vpop.f32.mrf.mxu1  ;;  %v2562_v44 = vunpack.i.h.bf16 %v3888_v10 }
 0x2c0   : > { %1604 = vrot.lane.b32.xlu1 %v3768_v52, %s2635_s30  ;;  %1526 = vrot.lane.b32.xlu0 %v3776_v26, %s2630_s27  ;;  %4717 = vst [vmem:[#allocation33_spill] sm:$0xff] %v3849_v38  ;;  %v1457_v62 = vmul.f32 %v3688_v2, %v3849_v38  ;;  %v1920_v31 = vmul.f32 %v3741_v35, %v3849_v38 }
 0x2c1   : > { %v3872_v15 = vpop.f32.mrf.mxu1 }
 0x2c2   : > { %4719 = vst [vmem:[#allocation53_spill] sm:$0xff] %v3872_v15  ;;  %v3901_v58 = vpop.permute.xlu0 %1687  ;;  %v1458_v40 = vmul.f32 %v3688_v2, %v3872_v15 }
 0x2c3   : > { %v3903_v11 = vpop.f32.mrf.mxu1 }
 0x2c4   : > { %1818 = vrot.lane.b32.xlu1 %v3768_v52, %s2633_s29  ;;  %1606 = vrot.lane.b32.xlu0 %v3776_v26, %s2635_s30  ;;  %4721 = vst [vmem:[#allocation31_spill] sm:$0xff] %v3903_v11 }
 0x2c6   : > { %v3913_v21 = vpop.permute.xlu0 %2566 }
 0x2c7   : > { %4722 = vst [vmem:[#allocation42_spill] sm:$0xff] %v3913_v21 }
 0x2c8   : > { %1476 = vrot.lane.b32.xlu1 %v1451_v23, %s2638_s9  ;;  %1820 = vrot.lane.b32.xlu0 %v3776_v26, %s2633_s29  ;;  %v3923_v23 = vpop.permute.xlu1 %2589 }
 0x2ca   : > { %v3925_v2 = vpop.permute.xlu0 %1683 }
 0x2cc   : > { %1740 = vrot.lane.b32.xlu1 %v3776_v26, %s2631_s28  ;;  %1530 = vrot.lane.b32.xlu0 %v3804_v51, %s2630_s27 }
 0x2d0   : > { %1478 = vrot.lane.b32.xlu0 %v1452_v55, %s2638_s9  ;;  %1358 = vrot.lane.b32.xlu1 %v3804_v51, %s2624_s26  ;;  %v3927_v55 = vpop.f32.mrf.mxu1 }
 0x2d1   : > { %4723 = vst [vmem:[#allocation35_spill] sm:$0xff] %v3927_v55 }
 0x2d4   : > { %1610 = vrot.lane.b32.xlu1 %v3804_v51, %s2635_s30  ;;  %1360 = vrot.lane.b32.xlu0 %v3818_v54, %s2624_s26 }
 0x2d8   : > { %1744 = vrot.lane.b32.xlu1 %v3804_v51, %s2631_s28  ;;  %1482 = vrot.lane.b32.xlu0 %v1454_v1, %s2638_s9  ;;  %v3933_v1 = vpop.permute.xlu1 %2594 }
 0x2d9   : > { %4724 = vst [vmem:[#allocation41_spill] sm:$0xff] %v3933_v1 }
 0x2dc   : > { %1824 = vrot.lane.b32.xlu1 %v3804_v51, %s2633_s29  ;;  %1612 = vrot.lane.b32.xlu0 %v3818_v54, %s2635_s30 }
 0x2e0   : > { %1532 = vrot.lane.b32.xlu1 %v3818_v54, %s2630_s27  ;;  %1826 = vrot.lane.b32.xlu0 %v3818_v54, %s2633_s29 }
 0x2e4   : > { %1746 = vrot.lane.b32.xlu1 %v3818_v54, %s2631_s28  ;;  %1364 = vrot.lane.b32.xlu0 %v3849_v38, %s2624_s26 }
 0x2e8   : > { %1994 = vrot.lane.b32.xlu1 %v3818_v54, %s2637_s8  ;;  %1536 = vrot.lane.b32.xlu0 %v3849_v38, %s2630_s27 }
 0x2ec   : > { %1484 = vrot.lane.b32.xlu1 %v1455_v32, %s2638_s9  ;;  %1616 = vrot.lane.b32.xlu0 %v3849_v38, %s2635_s30  ;;  %v3935_v32 = vpop.permute.xlu0 %1879 }
 0x2ed   : > { %4725 = vst [vmem:[#allocation48_spill] sm:$0xff] %v3935_v32 }
 0x2f0   : > { %1750 = vrot.lane.b32.xlu0 %v3849_v38, %s2631_s28  ;;  %1366 = vrot.lane.b32.xlu1 %v3872_v15, %s2624_s26 }
 0x2f4   : > { %1830 = vrot.lane.b32.xlu0 %v3849_v38, %s2633_s29  ;;  %1538 = vrot.lane.b32.xlu1 %v3872_v15, %s2630_s27 }
 0x2f8   : > { %1998 = vrot.lane.b32.xlu0 %v3849_v38, %s2637_s8  ;;  %1618 = vrot.lane.b32.xlu1 %v3872_v15, %s2635_s30 }
 0x2fc   : > { %1488 = vrot.lane.b32.xlu0 %v1457_v62, %s2638_s9  ;;  %1752 = vrot.lane.b32.xlu1 %v3872_v15, %s2631_s28  ;;  %v1460_v62 = vmul.f32 %v3585_v24, %v3903_v11 }
 0x300   : > { %1832 = vrot.lane.b32.xlu0 %v3872_v15, %s2633_s29  ;;  %1542 = vrot.lane.b32.xlu1 %v3903_v11, %s2630_s27 }
 0x304   : > { %2000 = vrot.lane.b32.xlu0 %v3872_v15, %s2637_s8  ;;  %1490 = vrot.lane.b32.xlu1 %v1458_v40, %s2638_s9  ;;  %v3943_v40 = vpop.permute.xlu1 %1960 }
 0x305   : > { %4726 = vst [vmem:[#allocation52_spill] sm:$0xff] %v3943_v40  ;;  %v1921_v40 = vmul.f32 %v3741_v35, %v3872_v15  ;;  %v1461_v35 = vmul.f32 %v3585_v24, %v3927_v55 }
 0x308   : > { %1950 = vrot.lane.b32.xlu0 %v1920_v31, %s2639_s10  ;;  %1756 = vrot.lane.b32.xlu1 %v3903_v11, %s2631_s28  ;;  %v3948_v31 = vpop.permute.xlu0 %1875  ;;  %v3954_v32 = vpop.permute.xlu1 %2039 }
 0x309   : > { %4727 = vst [vmem:[#allocation4_spill] sm:$0xff] %v3948_v31  ;;  %4728 = vst [vmem:[#allocation51_spill] sm:$0xff] %v3954_v32 }
 0x30c   : > { %1370 = vrot.lane.b32.xlu0 %v3903_v11, %s2624_s26  ;;  %1372 = vrot.lane.b32.xlu1 %v3927_v55, %s2624_s26  ;;  %v3956_v56 = vpop.permute.xlu0 %2047  ;;  %v3965_v31 = vpop.permute.xlu1 %1954 }
 0x30d   : > { %4729 = vst [vmem:[#allocation43_spill] sm:$0xff] %v3956_v56  ;;  %4730 = vst [vmem:[#allocation20_spill] sm:$0xff] %v3965_v31  ;;  %v1919_v56 = vmul.f32 0.0, %v3748_v53 }
 0x310   : > { %1622 = vrot.lane.b32.xlu0 %v3903_v11, %s2635_s30  ;;  %1544 = vrot.lane.b32.xlu1 %v3927_v55, %s2630_s27  ;;  %v3967_v43 = vpop.permute.xlu0 %2043  ;;  %v3980_v31 = vpop.permute.xlu1 %2035 }
 0x311   : > { %4731 = vst [vmem:[#allocation37_spill] sm:$0xff] %v3967_v43  ;;  %4733 = vst [vmem:[#allocation17_spill] sm:$0xff] %v3980_v31  ;;  %v1918_v43 = vmul.f32 %v3748_v53, %v3818_v54  ;;  %v1924_v31 = vmul.f32 %v3735_v41, %v3927_v55 }
 0x314   : > { %1836 = vrot.lane.b32.xlu0 %v3903_v11, %s2633_s29  ;;  %1494 = vrot.lane.b32.xlu1 %v1460_v62, %s2638_s9  ;;  %v1923_v62 = vmul.f32 %v3735_v41, %v3903_v11  ;;  %v2574_v41 = vunpack.i.h.bf16 %v3835_v4 }
 0x318   : > { %2004 = vrot.lane.b32.xlu0 %v3903_v11, %s2637_s8  ;;  %1624 = vrot.lane.b32.xlu1 %v3927_v55, %s2635_s30 }
 0x31c   : > { %1952 = vrot.lane.b32.xlu0 %v1921_v40, %s2639_s10  ;;  %1758 = vrot.lane.b32.xlu1 %v3927_v55, %s2631_s28  ;;  %v3977_v40 = vpop.permute.xlu0 %2600 }
 0x31d   : > { %4732 = vst [vmem:[#allocation44_spill] sm:$0xff] %v3977_v40 }
 0x320   : > { %1838 = vrot.lane.b32.xlu0 %v3927_v55, %s2633_s29  ;;  %1956 = vrot.lane.b32.xlu1 %v1923_v62, %s2639_s10 }
 0x324   : > { %2006 = vrot.lane.b32.xlu0 %v3927_v55, %s2637_s8  ;;  %1496 = vrot.lane.b32.xlu1 %v1461_v35, %s2638_s9 }
 0x328   : > { %1948 = vrot.lane.b32.xlu0 %v1919_v56, %s2639_s10  ;;  %1946 = vrot.lane.b32.xlu1 %v1918_v43, %s2639_s10  ;;  %v1916_v56 = vmul.f32 0.0, %v3750_v29  ;;  %v2532_v43 = vunpack.i.l.bf16 %v3788_v37 }
 0x32a   : > { %v1739_v62 = vpop.permute.xlu0 %1738  ;;  %v1353_v24 = vpop.permute.xlu1 %1352 }
 0x32b   : > { %v1374_v11 = vsel %vm496_vm2, %v2532_v43, %v1353_v24 }
 0x32c   : > { %1944 = vrot.lane.b32.xlu0 %v1917_v6, %s2639_s10  ;;  %1992 = vrot.lane.b32.xlu1 %v3804_v51, %s2637_s8  ;;  %v1915_v6 = vmul.f32 %v3750_v29, %v3776_v26  ;;  %v1390_v48 = vsel %vm3250_vm3, %v1374_v11, 0.0 }
 0x32d   : > { %v1418_v29 = vmul.f32 %v3820_v22, %v1390_v48 }
 0x32e   : > { %v1525_v35 = vpop.permute.xlu1 %1524  ;;  %v1355_v32 = vpop.permute.xlu0 %1354 }
 0x330   : > { %1958 = vrot.lane.b32.xlu0 %v1924_v31, %s2639_s10  ;;  %1988 = vrot.lane.b32.xlu1 %v3776_v26, %s2637_s8  ;;  %v1546_v31 = vsel %vm674_vm4, %v2562_v44, %v1525_v35  ;;  %v4019_v44 = vld [vmem:[%s4481_s6] sm:$0xff] }
 0x332   : > { %v1605_v53 = vpop.permute.xlu1 %1604  ;;  %v1527_v17 = vpop.permute.xlu0 %1526 }
 0x333   : > { %v1626_v1 = vsel %vm755_vm5, %v2574_v41, %v1605_v53  ;;  %v1547_v48 = vsel %vm674_vm4, %v1525_v35, %v1527_v17  ;;  %v4734_v35 = vmov 2  }
 0x334   : > { %1940 = vrot.lane.b32.xlu0 %v1915_v6, %s2639_s10  ;;  %1942 = vrot.lane.b32.xlu1 %v1916_v56, %s2639_s10  ;;  %v1562_v56 = vsel %vm3254_vm6, %v1546_v31, 0.0  ;;  %v1642_v11 = vsel %vm3250_vm3, %v1626_v1, 0.0  ;;  %v1375_v31 = vsel %vm496_vm2, %v1353_v24, %v1355_v32  ;;  %v1698_v32 = vmul.f32 %v3925_v2, %v3768_v52 }
 0x335   : > { %v1586_v25 = vmul.f32 %v3865_v8, %v1562_v56  ;;  %v1666_v21 = vmul.f32 %v3802_v3, %v1642_v11  ;;  %v1563_v56 = vsel %vm3262_vm9, %v1547_v48, 0.0 }
 0x336   : > { %v1819_v55 = vpop.permute.xlu1 %1818  ;;  %v1607_v15 = vpop.permute.xlu0 %1606 }
 0x338   : > { %1986 = vrot.lane.b32.xlu0 %v3768_v52, %s2637_s8  ;;  %1938 = vrot.lane.b32.xlu1 %v1914_v5, %s2639_s10  ;;  %v2561_v52 = vunpack.i.l.bf16 %v3888_v10  ;;  %v1587_v10 = vmul.f32 %v3865_v8, %v1563_v56  ;;  %v2573_v8 = vunpack.i.l.bf16 %v3835_v4 }
 0x33a   : > { %v1477_v43 = vpop.permute.xlu1 %1476  ;;  %v1821_v6 = vpop.permute.xlu0 %1820 }
 0x33b   : > { %v1498_v41 = vsel %vm621_vm7, %v3857_v12, %v1477_v43  ;;  %v1842_v5 = vsel %vm973_vm11, %v1819_v55, %v1821_v6  ;;  %v1391_v12 = vsel %vm3258_vm8, %v1375_v31, 0.0  ;;  %v1627_v55 = vsel %vm755_vm5, %v1605_v53, %v1607_v15 }
 0x33c   : > { %v1514_v40 = vadd.f32 %v1498_v41, %v1418_v29  ;;  %2180 = vperm.xlu0 %2604, %v4019_v44   ;;  %2296 = vperm.xlu1 %2605, %v4019_v44   ;;  %v4735_v29 = vmov 0   ;;  %v2533_v15 = vunpack.i.h.bf16 %v3788_v37  ;;  %v1643_v53 = vsel %vm3258_vm8, %v1627_v55, 0.0 }
 0x33d   : > { %v2592_v37 = vunpack.i.h.bf16 %v3923_v23 }
 0x33e   : > { %v1594_v61 = vadd.f32 %v1586_v25, %v1514_v40  ;;  %v1741_v1 = vpop.permute.xlu1 %1740  ;;  %v4033_v38 = vpop.permute.xlu0 %1530  ;;  %v1858_v25 = vsel %vm3250_vm3, %v1842_v5, 0.0 }
 0x33f   : > { %v1762_v24 = vsel %vm892_vm10, %v1739_v62, %v1741_v1  ;;  %v1882_v31 = vmul.f32 %v3911_v45, %v1858_v25  ;;  %v1843_v55 = vsel %vm973_vm11, %v1821_v6, %v2592_v37 }
 0x340   : > { %v1674_v17 = vadd.f32 %v1666_v21, %v1594_v61  ;;  %v1778_v40 = vsel %vm3254_vm6, %v1762_v24, 0.0  ;;  %2607 = vset.pattern.permute.xlu0 %v4734_v35  ;;  %2606 = vset.pattern.permute.xlu1 %v4735_v29  ;;  %v2587_v61 = vunpack.i.h.bf16 %v3899_v34  ;;  %v1419_v21 = vmul.f32 %v3820_v22, %v1391_v12 }
 0x341   : > { %v1802_v62 = vmul.f32 %v3880_v49, %v1778_v40  ;;  %2214 = vperm.xlu0 %2607, %v4019_v44   ;;  %2172 = vperm.xlu1 %2606, %v4019_v44   ;;  %v1667_v12 = vmul.f32 %v3802_v3, %v1643_v53 }
 0x342   : > { %v1706_v11 = vadd.f32 %v1698_v32, %v1674_v17  ;;  %v1479_v41 = vpop.permute.xlu0 %1478  ;;  %v1359_v5 = vpop.permute.xlu1 %1358  ;;  %v1763_v24 = vsel %vm892_vm10, %v1741_v1, %v2587_v61 }
 0x343   : > { %v1499_v48 = vsel %vm621_vm7, %v1477_v43, %v1479_v41  ;;  %v1376_v22 = vsel %vm496_vm2, %v2533_v15, %v1359_v5  ;;  %v1548_v43 = vsel %vm674_vm4, %v2561_v52, %v4033_v38  ;;  %v1779_v3 = vsel %vm3262_vm9, %v1763_v24, 0.0 }
 0x344   : > { %v1810_v40 = vadd.f32 %v1802_v62, %v1706_v11  ;;  %v1515_v35 = vadd.f32 %v1499_v48, %v1419_v21  ;;  %v1392_v6 = vsel %vm3250_vm3, %v1376_v22, 0.0  ;;  %v1699_v15 = vmul.f32 %v3925_v2, %v3776_v26 }
 0x345   : > { %2201 = vrot.lane.b32.xlu0 %v4617_v30, %s2630_s27  ;;  %2158 = vrot.lane.b32.xlu1 %v4617_v30, %s2624_s26  ;;  %v1859_v52 = vsel %vm3258_vm8, %v1843_v55, 0.0  ;;  %v1420_v62 = vmul.f32 %v3810_v28, %v1392_v6  ;;  %v1700_v55 = vmul.f32 %v3901_v58, %v3804_v51 }
 0x346   : > { %v1595_v1 = vadd.f32 %v1587_v10, %v1515_v35  ;;  %v1611_v32 = vpop.permute.xlu1 %1610  ;;  %v1361_v56 = vpop.permute.xlu0 %1360  ;;  %v4073_v17 = vadd.f32 %v1882_v31, %v1810_v40  ;;  %2609 = vset.pattern.permute.xlu0 %v4623_v27  ;;  %2608 = vset.pattern.permute.xlu1 %v4708_v16  ;;  %v1564_v27 = vsel %vm3254_vm6, %v1548_v43, 0.0  ;;  %v1803_v16 = vmul.f32 %v3880_v49, %v1779_v3 }
 0x347   : > { %v1377_v4 = vsel %vm496_vm2, %v1359_v5, %v1361_v56  ;;  %v1628_v29 = vsel %vm755_vm5, %v2573_v8, %v1611_v32  ;;  %v1883_v11 = vmul.f32 %v3911_v45, %v1859_v52  ;;  %v1588_v41 = vmul.f32 %v3760_v50, %v1564_v27 }
 0x348   : > { %v1675_v25 = vadd.f32 %v1667_v12, %v1595_v1  ;;  %v1644_v26 = vsel %vm3250_vm3, %v1628_v29, 0.0  ;;  %v1393_v3 = vsel %vm3258_vm8, %v1377_v4, 0.0 }
 0x349   : > { %2242 = vperm.xlu0 %2609, %v4019_v44   ;;  %2234 = vperm.xlu1 %2608, %v4019_v44   ;;  %v1668_v49 = vmul.f32 %v3770_v39, %v1644_v26  ;;  %v1421_v52 = vmul.f32 %v3810_v28, %v1393_v3 }
 0x34a   : > { %v1745_v61 = vpop.permute.xlu1 %1744  ;;  %v1483_v21 = vpop.permute.xlu0 %1482  ;;  %v1707_v53 = vadd.f32 %v1699_v15, %v1675_v25  ;;  %v2586_v15 = vunpack.i.l.bf16 %v3899_v34 }
 0x34b   : > { %v1500_v2 = vsel %vm621_vm7, %v3826_v9, %v1483_v21 }
 0x34c   : > { %v1516_v5 = vadd.f32 %v1500_v2, %v1420_v62  ;;  %v1811_v37 = vadd.f32 %v1803_v16, %v1707_v53 }
 0x34d   : > { %2611 = vset.pattern.permute.xlu0 %v4652_v20  ;;  %2610 = vset.pattern.permute.xlu1 %v4704_v59 }
 0x34e   : > { %v1596_v10 = vadd.f32 %v1588_v41, %v1516_v5  ;;  %v1825_v31 = vpop.permute.xlu1 %1824  ;;  %v1613_v48 = vpop.permute.xlu0 %1612  ;;  %v4102_v24 = vadd.f32 %v1883_v11, %v1811_v37  ;;  %2288 = vperm.xlu0 %2611, %v4019_v44  }
 0x34f   : > { %v1629_v9 = vsel %vm755_vm5, %v1611_v32, %v1613_v48 }
 0x350   : > { %v1676_v45 = vadd.f32 %v1668_v49, %v1596_v10  ;;  %v1645_v62 = vsel %vm3258_vm8, %v1629_v9, 0.0  ;;  %v2547_v9 = vunpack.i.h.bf16 %v3841_v60 }
 0x351   : > { %v1669_v11 = vmul.f32 %v3770_v39, %v1645_v62  ;;  %v4736_v62 = vld [vmem:[#allocation33_spill] sm:$0xff] }
 0x352   : > { %v1533_v40 = vpop.permute.xlu1 %1532  ;;  %v1827_v35 = vpop.permute.xlu0 %1826  ;;  %2259 = vrot.lane.b32.xlu0 %v4617_v30, %s2631_s28  ;;  %v1708_v1 = vadd.f32 %v1700_v55, %v1676_v45 }
 0x353   : > { %v1549_v20 = vsel %vm674_vm4, %v4033_v38, %v1533_v40  ;;  %v1844_v59 = vsel %vm973_vm11, %v1825_v31, %v1827_v35  ;;  %2612 = vset.pattern.permute.xlu0 %v4670_v57 }
 0x354   : > { %v1860_v43 = vsel %vm3250_vm3, %v1844_v59, 0.0  ;;  %v1565_v25 = vsel %vm3262_vm9, %v1549_v20, 0.0 }
 0x355   : > { %v1884_v51 = vmul.f32 %v3886_v33, %v1860_v43  ;;  %v1589_v53 = vmul.f32 %v3760_v50, %v1565_v25 }
 0x356   : > { %v1747_v22 = vpop.permute.xlu1 %1746  ;;  %v4112_v12 = vpop.permute.xlu0 %1364  ;;  %2330 = vperm.xlu0 %2612, %v4019_v44  }
 0x357   : > { %v1764_v8 = vsel %vm892_vm10, %v1745_v61, %v1747_v22  ;;  %v2591_v61 = vunpack.i.l.bf16 %v3923_v23  ;;  %v1765_v26 = vsel %vm892_vm10, %v1747_v22, %v2586_v15  ;;  %v1701_v23 = vmul.f32 %v3901_v58, %v3818_v54 }
 0x358   : > { %v1780_v38 = vsel %vm3254_vm6, %v1764_v8, 0.0  ;;  %v1781_v37 = vsel %vm3262_vm9, %v1765_v26, 0.0  ;;  %v2554_v54 = vunpack.i.h.bf16 %v3766_v46 }
 0x359   : > { %v1804_v32 = vmul.f32 %v3847_v14, %v1780_v38  ;;  %v1845_v34 = vsel %vm973_vm11, %v1827_v35, %v2591_v61  ;;  %v1805_v39 = vmul.f32 %v3847_v14, %v1781_v37 }
 0x35a   : > { %v4123_v57 = vpop.permute.xlu1 %1994  ;;  %v4125_v56 = vpop.permute.xlu0 %1536  ;;  %v1861_v50 = vsel %vm3258_vm8, %v1845_v34, 0.0 }
 0x35b   : > { %v1812_v6 = vadd.f32 %v1804_v32, %v1708_v1  ;;  %v1885_v45 = vmul.f32 %v3886_v33, %v1861_v50  ;;  %v1550_v58 = vsel %vm674_vm4, %v2547_v9, %v4125_v56  ;;  %v2538_v50 = vunpack.i.h.bf16 %v3752_v0 }
 0x35c   : > { %v1566_v55 = vsel %vm3254_vm6, %v1550_v58, 0.0 }
 0x35d   : > { %v4132_v29 = vadd.f32 %v1884_v51, %v1812_v6  ;;  %v1590_v3 = vmul.f32 %v3758_v18, %v1566_v55 }
 0x35e   : > { %v1485_v27 = vpop.permute.xlu1 %1484  ;;  %v4136_v16 = vpop.permute.xlu0 %1616 }
 0x35f   : > { %v1501_v4 = vsel %vm621_vm7, %v1483_v21, %v1485_v27  ;;  %v2537_v21 = vunpack.i.l.bf16 %v3752_v0  ;;  %v1630_v33 = vsel %vm755_vm5, %v2554_v54, %v4136_v16  ;;  %v2553_v0 = vunpack.i.l.bf16 %v3766_v46  ;;  %v4740_v46 = vld [vmem:[#allocation49_spill] sm:$0xff] }
 0x360   : > { %v1517_v2 = vadd.f32 %v1501_v4, %v1421_v52  ;;  %v1646_v1 = vsel %vm3250_vm3, %v1630_v33, 0.0  ;;  %v4737_v4 = vld [vmem:[#allocation32_spill] sm:$0xff] }
 0x361   : > { %v1378_v40 = vsel %vm496_vm2, %v2537_v21, %v4112_v12  ;;  %v1670_v6 = vmul.f32 %v3855_v7, %v1646_v1  ;;  %v1702_v61 = vmul.f32 %v4737_v4, %v4736_v62  ;;  %v2579_v1 = vunpack.i.l.bf16 %v4740_v46 }
 0x362   : > { %v1597_v28 = vadd.f32 %v1589_v53, %v1517_v2  ;;  %v4146_v41 = vpop.permute.xlu0 %1750  ;;  %v1367_v5 = vpop.permute.xlu1 %1366  ;;  %v1394_v22 = vsel %vm3250_vm3, %v1378_v40, 0.0 }
 0x363   : > { %v1422_v8 = vmul.f32 %v3754_v19, %v1394_v22 }
 0x364   : > { %v1677_v49 = vadd.f32 %v1669_v11, %v1597_v28 }
 0x366   : > { %v4156_v10 = vpop.permute.xlu0 %1830  ;;  %v1539_v31 = vpop.permute.xlu1 %1538  ;;  %v1709_v48 = vadd.f32 %v1701_v23, %v1677_v49  ;;  %v1379_v23 = vsel %vm496_vm2, %v4112_v12, %v1367_v5  ;;  %v4738_v5 = vld [vmem:[#allocation42_spill] sm:$0xff] }
 0x367   : > { %v1395_v21 = vsel %vm3258_vm8, %v1379_v23, 0.0  ;;  %v1551_v9 = vsel %vm674_vm4, %v4125_v56, %v1539_v31  ;;  %v2569_v54 = vunpack.i.h.bf16 %v4738_v5  ;;  %v2568_v58 = vunpack.i.l.bf16 %v4738_v5  ;;  %v4739_v31 = vld [vmem:[#allocation44_spill] sm:$0xff]  ;;  %v4743_v23 = vld [vmem:[#allocation27_spill] sm:$0xff] }
 0x368   : > { %v1813_v35 = vadd.f32 %v1805_v39, %v1709_v48  ;;  %v1423_v12 = vmul.f32 %v3754_v19, %v1395_v21  ;;  %v1567_v22 = vsel %vm3262_vm9, %v1551_v9, 0.0  ;;  %v2602_v55 = vunpack.i.l.bf16 %v4739_v31 }
 0x36a   : > { %v4165_v20 = vpop.permute.xlu0 %1998  ;;  %v1619_v14 = vpop.permute.xlu1 %1618  ;;  %v4167_v59 = vadd.f32 %v1885_v45, %v1813_v35  ;;  %v2546_v35 = vunpack.i.l.bf16 %v3841_v60 }
 0x36e   : > { %v1489_v43 = vpop.permute.xlu0 %1488  ;;  %v1753_v38 = vpop.permute.xlu1 %1752 }
 0x36f   : > { %v1502_v32 = vsel %vm621_vm7, %v3790_v13, %v1489_v43 }
 0x370   : > { %v1518_v51 = vadd.f32 %v1502_v32, %v1422_v8  ;;  %v1631_v8 = vsel %vm755_vm5, %v4136_v16, %v1619_v14  ;;  %v2603_v32 = vunpack.i.h.bf16 %v4739_v31  ;;  %v4742_v16 = vld [vmem:[#allocation47_spill] sm:$0xff] }
 0x371   : > { %v1647_v62 = vsel %vm3258_vm8, %v1631_v8, 0.0 }
 0x372   : > { %v1598_v25 = vadd.f32 %v1590_v3, %v1518_v51  ;;  %v1833_v15 = vpop.permute.xlu0 %1832  ;;  %v1543_v52 = vpop.permute.xlu1 %1542  ;;  %v4741_v51 = vld [vmem:[#allocation41_spill] sm:$0xff] }
 0x373   : > { %v1552_v3 = vsel %vm674_vm4, %v2546_v35, %v1543_v52  ;;  %v4744_v35 = vld [vmem:[#allocation53_spill] sm:$0xff] }
 0x374   : > { %v1678_v27 = vadd.f32 %v1670_v6, %v1598_v25  ;;  %v2597_v6 = vunpack.i.h.bf16 %v4741_v51  ;;  %v2013_v25 = vsel %vm1143_vm12, %v4123_v57, %v2602_v55 }
 0x375   : > { %v2029_v8 = vsel %vm3262_vm9, %v2013_v25, 0.0 }
 0x376   : > { %v4184_v53 = vadd.f32 %v1702_v61, %v1678_v27  ;;  %v4186_v26 = vpop.permute.xlu0 %2000  ;;  %v1491_v2 = vpop.permute.xlu1 %1490  ;;  %v1591_v27 = vmul.f32 %v3758_v18, %v1567_v22  ;;  %v1766_v61 = vsel %vm892_vm10, %v4146_v41, %v1753_v38  ;;  %v1568_v18 = vsel %vm3254_vm6, %v1552_v3, 0.0 }
 0x377   : > { %v1503_v45 = vsel %vm621_vm7, %v1489_v43, %v1491_v2  ;;  %v2580_v43 = vunpack.i.h.bf16 %v4740_v46  ;;  %v1767_v2 = vsel %vm892_vm10, %v1753_v38, %v2569_v54  ;;  %v4745_v38 = vld [vmem:[#allocation31_spill] sm:$0xff]  ;;  %v4746_v54 = vld [vmem:[#allocation6_spill] sm:$0xff]  ;;  %v1782_v3 = vsel %vm3254_vm6, %v1766_v61, 0.0  ;;  %v4753_v46 = vld [vmem:[#allocation5_spill] sm:$0xff] }
 0x378   : > { %v1519_v60 = vadd.f32 %v1503_v45, %v1423_v12  ;;  %v2596_v45 = vunpack.i.l.bf16 %v4741_v51  ;;  %v1703_v12 = vmul.f32 %v4737_v4, %v4744_v35  ;;  %v1704_v55 = vmul.f32 %v4746_v54, %v4745_v38  ;;  %v4748_v61 = vld [vmem:[#allocation35_spill] sm:$0xff]  ;;  %v4751_v38 = vld [vmem:[#allocation12_spill] sm:$0xff] }
 0x379   : > { %v1846_v4 = vsel %vm973_vm11, %v4156_v10, %v1833_v15  ;;  %v4749_v10 = vld [vmem:[#allocation51_spill] sm:$0xff] }
 0x37a   : > { %v4188_v11 = vpop.permute.xlu0 %1950  ;;  %v4190_v13 = vpop.permute.xlu1 %1756 }
 0x37e   : > { %v1371_v34 = vpop.permute.xlu0 %1370  ;;  %v1373_v28 = vpop.permute.xlu1 %1372 }
 0x37f   : > { %v1380_v40 = vsel %vm496_vm2, %v2538_v50, %v1371_v34  ;;  %v1381_v5 = vsel %vm496_vm2, %v1371_v34, %v1373_v28  ;;  %v1847_v34 = vsel %vm973_vm11, %v1833_v15, %v2580_v43  ;;  %v4747_v28 = vld [vmem:[#allocation9_spill] sm:$0xff]  ;;  %v4750_v15 = vld [vmem:[#allocation54_spill] sm:$0xff] }
 0x380   : > { %v1396_v19 = vsel %vm3250_vm3, %v1380_v40, 0.0  ;;  %v1599_v40 = vadd.f32 %v1591_v27, %v1519_v60  ;;  %v1783_v60 = vsel %vm3262_vm9, %v1767_v2, 0.0  ;;  %v1705_v2 = vmul.f32 %v4746_v54, %v4748_v61 }
 0x381   : > { %v1424_v50 = vmul.f32 %v4743_v23, %v1396_v19  ;;  %v1671_v19 = vmul.f32 %v3855_v7, %v1647_v62  ;;  %v1397_v7 = vsel %vm3258_vm8, %v1381_v5, 0.0  ;;  %v1806_v43 = vmul.f32 %v4750_v15, %v1782_v3 }
 0x382   : > { %v1623_v37 = vpop.permute.xlu0 %1622  ;;  %v1545_v49 = vpop.permute.xlu1 %1544  ;;  %v1863_v35 = vsel %vm3258_vm8, %v1847_v34, 0.0 }
 0x383   : > { %v1632_v41 = vsel %vm755_vm5, %v2553_v0, %v1623_v37  ;;  %v1592_v0 = vmul.f32 %v4747_v28, %v1568_v18  ;;  %v1553_v27 = vsel %vm674_vm4, %v1543_v52, %v1545_v49  ;;  %v1679_v25 = vadd.f32 %v1671_v19, %v1599_v40 }
 0x384   : > { %v1648_v62 = vsel %vm3250_vm3, %v1632_v41, 0.0  ;;  %v1807_v49 = vmul.f32 %v4750_v15, %v1783_v60  ;;  %v1862_v40 = vsel %vm3250_vm3, %v1846_v4, 0.0  ;;  %v1569_v5 = vsel %vm3262_vm9, %v1553_v27, 0.0  ;;  %v4752_v27 = vld [vmem:[#allocation4_spill] sm:$0xff] }
 0x385   : > { %v4282_v41 = vsel %vm1143_vm12, %v4165_v20, %v4186_v26  ;;  %v1711_v3 = vadd.f32 %v1703_v12, %v1679_v25  ;;  %v1593_v20 = vmul.f32 %v4747_v28, %v1569_v5  ;;  %v1814_v61 = vadd.f32 %v1806_v43, %v4184_v53  ;;  %v4754_v53 = vld [vmem:[#allocation20_spill] sm:$0xff] }
 0x386   : > { %v4197_v39 = vpop.permute.xlu0 %1836  ;;  %v4199_v48 = vpop.permute.xlu1 %1494  ;;  %v4755_v5 = vld [vmem:[#allocation48_spill] sm:$0xff] }
 0x387   : > { %v1504_v14 = vsel %vm621_vm7, %v4742_v16, %v4199_v48 }
 0x388   : > { %v1520_v22 = vadd.f32 %v1504_v14, %v1424_v50  ;;  %v4268_v50 = vmul.f32 %v4749_v10, %v2029_v8 }
 0x38a   : > { %v4212_v33 = vpop.permute.xlu0 %2004  ;;  %v1625_v56 = vpop.permute.xlu1 %1624  ;;  %v1600_v18 = vadd.f32 %v1592_v0, %v1520_v22  ;;  %v1425_v22 = vmul.f32 %v4743_v23, %v1397_v7  ;;  %v1887_v7 = vmul.f32 %v4752_v27, %v1863_v35 }
 0x38b   : > { %v1633_v52 = vsel %vm755_vm5, %v1623_v37, %v1625_v56  ;;  %v1672_v37 = vmul.f32 %v4751_v38, %v1648_v62  ;;  %v2015_v62 = vsel %vm1143_vm12, %v4186_v26, %v2597_v6  ;;  %v2030_v26 = vsel %vm3254_vm6, %v4282_v41, 0.0 }
 0x38c   : > { %v1649_v19 = vsel %vm3258_vm8, %v1633_v52, 0.0  ;;  %v1815_v6 = vadd.f32 %v1807_v49, %v1711_v3 }
 0x38d   : > { %v1680_v34 = vadd.f32 %v1672_v37, %v1600_v18  ;;  %v2031_v18 = vsel %vm3262_vm9, %v2015_v62, 0.0 }
 0x38e   : > { %v4236_v21 = vpop.permute.xlu0 %1952  ;;  %v1759_v9 = vpop.permute.xlu1 %1758 }
 0x38f   : > { %v1768_v56 = vsel %vm892_vm10, %v4190_v13, %v1759_v9  ;;  %v1769_v60 = vsel %vm892_vm10, %v1759_v9, %v2568_v58  ;;  %v1886_v13 = vmul.f32 %v4752_v27, %v1862_v40  ;;  %v1673_v9 = vmul.f32 %v4751_v38, %v1649_v19 }
 0x390   : > { %v1784_v58 = vsel %vm3254_vm6, %v1768_v56, 0.0  ;;  %v1712_v52 = vadd.f32 %v1704_v55, %v1680_v34  ;;  %v1967_v43 = vsel %vm1094_vm13, %v4236_v21, %v4754_v53  ;;  %v4756_v56 = vld [vmem:[#allocation37_spill] sm:$0xff]  ;;  %v1895_v19 = vadd.f32 %v1887_v7, %v1815_v6 }
 0x391   : > { %v1808_v40 = vmul.f32 %v4753_v46, %v1784_v58  ;;  %v4757_v58 = vld [vmem:[#allocation52_spill] sm:$0xff]  ;;  %v2054_v6 = vmul.f32 %v4756_v56, %v2030_v26 }
 0x392   : > { %v1839_v16 = vpop.permute.xlu0 %1838  ;;  %v4259_v14 = vpop.permute.xlu1 %1956  ;;  %v1983_v51 = vadd.f32 %v1967_v43, %v1895_v19  ;;  %v4759_v43 = vld [vmem:[#allocation17_spill] sm:$0xff] }
 0x393   : > { %v1848_v23 = vsel %vm973_vm11, %v4197_v39, %v1839_v16  ;;  %v1849_v39 = vsel %vm973_vm11, %v1839_v16, %v2579_v1  ;;  %v1966_v16 = vsel %vm1094_vm13, %v4188_v11, %v4236_v21  ;;  %v1894_v21 = vadd.f32 %v1886_v13, %v1814_v61 }
 0x394   : > { %v1864_v15 = vsel %vm3250_vm3, %v1848_v23, 0.0  ;;  %v1865_v35 = vsel %vm3258_vm8, %v1849_v39, 0.0  ;;  %v4758_v39 = vld [vmem:[#allocation43_spill] sm:$0xff] }
 0x395   : > { %v1888_v41 = vmul.f32 %v4755_v5, %v1864_v15  ;;  %v1982_v34 = vadd.f32 %v1966_v16, %v1894_v21 }
 0x396   : > { %v2007_v54 = vpop.permute.xlu0 %2006  ;;  %v1497_v8 = vpop.permute.xlu1 %1496 }
 0x397   : > { %v1505_v4 = vsel %vm621_vm7, %v4199_v48, %v1497_v8  ;;  %v1785_v48 = vsel %vm3262_vm9, %v1769_v60, 0.0  ;;  %v2016_v55 = vsel %vm1143_vm12, %v4212_v33, %v2007_v54  ;;  %v2055_v8 = vmul.f32 %v4756_v56, %v2031_v18 }
 0x398   : > { %v1521_v0 = vadd.f32 %v1505_v4, %v1425_v22  ;;  %v1809_v49 = vmul.f32 %v4753_v46, %v1785_v48  ;;  %v2017_v22 = vsel %vm1143_vm12, %v2007_v54, %v2596_v45  ;;  %v1816_v60 = vadd.f32 %v1808_v40, %v1712_v52 }
 0x399   : > { %v1889_v4 = vmul.f32 %v4755_v5, %v1865_v35  ;;  %v2032_v45 = vsel %vm3254_vm6, %v2016_v55, 0.0  ;;  %v2062_v40 = vadd.f32 %v2054_v6, %v1982_v34 }
 0x39a   : > { %v1601_v12 = vadd.f32 %v1593_v20, %v1521_v0  ;;  %v1949_v28 = vpop.permute.xlu0 %1948  ;;  %v1947_v25 = vpop.permute.xlu1 %1946 }
 0x39b   : > { %v1965_v20 = vsel %vm1094_vm13, %v1947_v25, %v1949_v28 }
 0x39c   : > { %v1681_v1 = vadd.f32 %v1673_v9, %v1601_v12  ;;  %v1981_v7 = vadd.f32 %v1965_v20, %v4167_v59  ;;  %v2056_v12 = vmul.f32 %v4758_v39, %v2032_v45 }
 0x39e   : > { %v1945_v38 = vpop.permute.xlu0 %1944  ;;  %v1993_v11 = vpop.permute.xlu1 %1992  ;;  %v1713_v37 = vadd.f32 %v1705_v2, %v1681_v1  ;;  %v2033_v2 = vsel %vm3262_vm9, %v2017_v22, 0.0  ;;  %v2061_v16 = vadd.f32 %v4268_v50, %v1981_v7  ;;  %v2070_v22 = vmax.f32 %v2062_v40, 0.0 }
 0x39f   : > { %v2012_v3 = vsel %vm1143_vm12, %v1993_v11, %v4123_v57  ;;  %v1964_v54 = vsel %vm1094_vm13, %v1945_v38, %v1947_v25  ;;  %v1896_v57 = vadd.f32 %v1888_v41, %v1816_v60  ;;  %v2057_v28 = vmul.f32 %v4758_v39, %v2033_v2  ;;  %v2074_v60 = vld [vmem:[%s4480_s5] sm:$0xff] }
 0x3a0   : > { %v1817_v33 = vadd.f32 %v1809_v49, %v1713_v37  ;;  %v2028_v23 = vsel %vm3254_vm6, %v2012_v3, 0.0  ;;  %v1980_v59 = vadd.f32 %v1964_v54, %v4132_v29 }
 0x3a1   : > { %v2052_v15 = vmul.f32 %v4749_v10, %v2028_v23 }
 0x3a2   : > { %v1959_v0 = vpop.permute.xlu0 %1958  ;;  %v1897_v27 = vadd.f32 %v1889_v4, %v1817_v33  ;;  %v1989_v13 = vpop.permute.xlu1 %1988 }
 0x3a3   : > { %v1968_v62 = vsel %vm1094_vm13, %v4259_v14, %v1959_v0  ;;  %v1969_v9 = vsel %vm1094_vm13, %v1959_v0, %v4757_v58  ;;  %v2011_v48 = vsel %vm1143_vm12, %v1989_v13, %v2603_v32  ;;  %v2063_v32 = vadd.f32 %v2055_v8, %v1983_v51 }
 0x3a4   : > { %v1984_v25 = vadd.f32 %v1968_v62, %v1896_v57  ;;  %v1985_v61 = vadd.f32 %v1969_v9, %v1897_v27  ;;  %v2027_v14 = vsel %vm3262_vm9, %v2011_v48, 0.0  ;;  %v2060_v10 = vadd.f32 %v2052_v15, %v1980_v59 }
 0x3a5   : > { %v2051_v26 = vmul.f32 %v4759_v43, %v2027_v14  ;;  %v2071_v41 = vmax.f32 %v2063_v32, 0.0 }
 0x3a6   : > { %v2064_v18 = vadd.f32 %v2056_v12, %v1984_v25  ;;  %v1941_v52 = vpop.permute.xlu0 %1940  ;;  %v1943_v31 = vpop.permute.xlu1 %1942  ;;  %v2065_v46 = vadd.f32 %v2057_v28, %v1985_v61  ;;  %v2068_v56 = vmax.f32 %v2060_v10, 0.0 }
 0x3a7   : > { %v1963_v1 = vsel %vm1094_vm13, %v1941_v52, %v1943_v31 }
 0x3a8   : > { %v2072_v53 = vmax.f32 %v2064_v18, 0.0  ;;  %v1979_v29 = vadd.f32 %v1963_v1, %v4102_v24  ;;  %v2073_v49 = vmax.f32 %v2065_v46, 0.0  ;;  %v2069_v24 = vmax.f32 %v2061_v16, 0.0 }
 0x3aa   : > { %v1987_v35 = vpop.permute.xlu0 %1986  ;;  %2103 = vmatprep.subr.mxu0 %v2073_v49  ;;  %v1939_v5 = vpop.permute.xlu1 %1938  ;;  %v2059_v55 = vadd.f32 %v2051_v26, %v1979_v29 }
 0x3ab   : > { %v2010_v38 = vsel %vm1143_vm12, %v1987_v35, %v1989_v13  ;;  %v1962_v11 = vsel %vm1094_vm13, %v1939_v5, %v1941_v52  ;;  %2104 = vmatpush1.msra.mxu0 %v2072_v53 }
 0x3ac   : > { %v2026_v50 = vsel %vm3254_vm6, %v2010_v38, 0.0  ;;  %v1978_v37 = vadd.f32 %v1962_v11, %v4073_v17  ;;  %2105 = vmatprep.subr.mxu0 %v2071_v41  ;;  %v2067_v21 = vmax.f32 %v2059_v55, 0.0 }
 0x3ad   : > { %v2050_v8 = vmul.f32 %v4759_v43, %v2026_v50  ;;  %2106 = vmatpush1.msra.mxu0 %v2070_v22 }
 0x3ae   : > { %2107 = vmatprep.subr.mxu0 %v2069_v24 }
 0x3af   : > { %v2058_v19 = vadd.f32 %v2050_v8, %v1978_v37  ;;  %2108 = vmatpush1.msra.mxu0 %v2068_v56 }
 0x3b0   : > { %2109 = vmatprep.subr.mxu0 %v2067_v21 }
 0x3b1   : > { %v2066_v3 = vmax.f32 %v2058_v19, 0.0 }
 0x3b3   : > { %2110 = vmatpush1.msra.mxu0 %v2066_v3 }
 0x3b4   : > { %2413 = vmatmul.mubr.msk.f32.vlgmr.msra.gmra.mxu0 %vm1216_vm14, %v2074_v60 }
 0x3b7   : > { %v2181_v17 = vpop.permute.xlu0 %2180  ;;  %v2297_v34 = vpop.permute.xlu1 %2296 }
 0x3b8   : > { %v2183_v4 = vmul.f32 0.0, %v2181_v17 }
 0x3ba   : > { %2189 = vrot.lane.b32.xlu1 %v2183_v4, %s2638_s9 }
 0x3bc   : > { %v2173_v54 = vpop.permute.xlu1 %2172  ;;  %v2215_v57 = vpop.permute.xlu0 %2214 }
 0x3be   : > { %2221 = vrot.lane.b32.xlu1 %v4617_v30, %s2635_s30 }
 0x3c0   : > { %v2159_v23 = vpop.permute.xlu1 %2158  ;;  %v2202_v27 = vpop.permute.xlu0 %2201 }
 0x3c2   : > { %2268 = vperm.xlu1 %2610, %v4019_v44  }
 0x3c4   : > { %v2235_v0 = vpop.permute.xlu1 %2234  ;;  %v2243_v7 = vpop.permute.xlu0 %2242 }
 0x3c6   : > { %2279 = vrot.lane.b32.xlu1 %v4617_v30, %s2633_s29 }
 0x3c9   : > { %v4418_v58 = vpop.permute.xlu0 %2288 }
 0x3cd   : > { %v2260_v48 = vpop.permute.xlu0 %2259 }
 0x3d1   : > { %v4420_v12 = vpop.permute.xlu0 %2330 }
 0x42c   : > { %v2190_v13 = vpop.permute.xlu1 %2189 }
 0x430   : > { %v2222_v62 = vpop.permute.xlu1 %2221 }
 0x43d   : > { %v2269_v9 = vpop.permute.xlu1 %2268 }
 0x441   : > { %v2280_v39 = vpop.permute.xlu1 %2279 }
 0x474   : > { %v4379_v20 = vpop.f32.mrf.mxu0 }
 0x475   : > { %2160 = vrot.lane.b32.xlu1 %v4379_v20, %s2624_s26  ;;  %v2184_v44 = vmul.f32 %v2181_v17, %v4379_v20  ;;  %v2299_v2 = vmul.f32 %v2297_v34, %v4379_v20  ;;  %v2245_v8 = vmul.f32 %v2243_v7, %v4379_v20 }
 0x476   : > { %v4383_v33 = vpop.f32.mrf.mxu0 }
 0x477   : > { %2162 = vrot.lane.b32.xlu0 %v4383_v33, %s2624_s26  ;;  %v2300_v51 = vmul.f32 %v2297_v34, %v4383_v33  ;;  %v2185_v45 = vmul.f32 %v2181_v17, %v4383_v33  ;;  %s2417_s26 = sshll.u32 %s4761_s25, 4 }
 0x479   : > { %2203 = vrot.lane.b32.xlu1 %v4379_v20, %s2630_s27 }
 0x47b   : > { %2205 = vrot.lane.b32.xlu0 %v4383_v33, %s2630_s27 }
 0x47d   : > { %2223 = vrot.lane.b32.xlu1 %v4379_v20, %s2635_s30 }
 0x47f   : > { %2191 = vrot.lane.b32.xlu0 %v2184_v44, %s2638_s9 }
 0x481   : > { %2255 = vrot.lane.b32.xlu1 %v4379_v20, %s2631_s28 }
 0x483   : > { %2225 = vrot.lane.b32.xlu0 %v4383_v33, %s2635_s30 }
 0x485   : > { %2275 = vrot.lane.b32.xlu1 %v4379_v20, %s2633_s29 }
 0x487   : > { %2277 = vrot.lane.b32.xlu0 %v4383_v33, %s2633_s29  ;;  %s278_s29 = scalar_lea.vmem %s4482_s7, %s2417_s26 }
 0x489   : > { %2317 = vrot.lane.b32.xlu1 %v4379_v20, %s2637_s8 }
 0x48b   : > { %2321 = vrot.lane.b32.xlu0 %v4617_v30, %s2637_s8  ;;  %v2301_v30 = vmul.f32 0.0, %v2297_v34 }
 0x48d   : > { %2257 = vrot.lane.b32.xlu1 %v4383_v33, %s2631_s28 }
 0x48f   : > { %2307 = vrot.lane.b32.xlu0 %v2300_v51, %s2639_s10 }
 0x491   : > { %2193 = vrot.lane.b32.xlu1 %v2185_v45, %s2638_s9 }
 0x495   : > { %2319 = vrot.lane.b32.xlu1 %v4383_v33, %s2637_s8 }
 0x499   : > { %2305 = vrot.lane.b32.xlu1 %v2299_v2, %s2639_s10 }
 0x49d   : > { %2309 = vrot.lane.b32.xlu1 %v2301_v30, %s2639_s10 }
 0x4e7   : > { %v2161_v28 = vpop.permute.xlu1 %2160 }
 0x4e8   : > { %v2164_v15 = vsel %vm496_vm2, %v2159_v23, %v2161_v28 }
 0x4e9   : > { %v2163_v25 = vpop.permute.xlu0 %2162  ;;  %v2168_v52 = vsel %vm3250_vm3, %v2164_v15, 0.0 }
 0x4ea   : > { %v2175_v32 = vmul.f32 %v2173_v54, %v2168_v52  ;;  %v2165_v10 = vsel %vm496_vm2, %v2161_v28, %v2163_v25  ;;  %v2246_v28 = vmul.f32 %v2243_v7, %v4383_v33 }
 0x4eb   : > { %v2204_v61 = vpop.permute.xlu1 %2203  ;;  %v2169_v38 = vsel %vm3258_vm8, %v2165_v10, 0.0 }
 0x4ec   : > { %v2207_v31 = vsel %vm674_vm4, %v2202_v27, %v2204_v61  ;;  %v2176_v21 = vmul.f32 %v2173_v54, %v2169_v38 }
 0x4ed   : > { %v2206_v6 = vpop.permute.xlu0 %2205  ;;  %v2211_v1 = vsel %vm3254_vm6, %v2207_v31, 0.0 }
 0x4ee   : > { %v2217_v26 = vmul.f32 %v2215_v57, %v2211_v1  ;;  %v2208_v5 = vsel %vm674_vm4, %v2204_v61, %v2206_v6 }
 0x4ef   : > { %v2224_v59 = vpop.permute.xlu1 %2223  ;;  %v2212_v56 = vsel %vm3262_vm9, %v2208_v5, 0.0 }
 0x4f0   : > { %v2227_v16 = vsel %vm755_vm5, %v2222_v62, %v2224_v59  ;;  %v2218_v44 = vmul.f32 %v2215_v57, %v2212_v56 }
 0x4f1   : > { %v2192_v14 = vpop.permute.xlu0 %2191  ;;  %v2231_v49 = vsel %vm3250_vm3, %v2227_v16, 0.0 }
 0x4f2   : > { %v2195_v46 = vsel %vm621_vm7, %v2190_v13, %v2192_v14  ;;  %v2237_v41 = vmul.f32 %v2235_v0, %v2231_v49 }
 0x4f3   : > { %v2256_v18 = vpop.permute.xlu1 %2255  ;;  %v2199_v53 = vadd.f32 %v2195_v46, %v2175_v32 }
 0x4f5   : > { %v2226_v43 = vpop.permute.xlu0 %2225  ;;  %v2219_v35 = vadd.f32 %v2217_v26, %v2199_v53 }
 0x4f6   : > { %v2228_v37 = vsel %vm755_vm5, %v2224_v59, %v2226_v43 }
 0x4f7   : > { %v2276_v40 = vpop.permute.xlu1 %2275  ;;  %v2239_v50 = vadd.f32 %v2237_v41, %v2219_v35  ;;  %v2232_v17 = vsel %vm3258_vm8, %v2228_v37, 0.0 }
 0x4f8   : > { %v2238_v30 = vmul.f32 %v2235_v0, %v2232_v17 }
 0x4f9   : > { %v2278_v55 = vpop.permute.xlu0 %2277  ;;  %v2247_v51 = vadd.f32 %v2245_v8, %v2239_v50 }
 0x4fa   : > { %v2281_v19 = vsel %vm973_vm11, %v2276_v40, %v2278_v55  ;;  %v2282_v54 = vsel %vm973_vm11, %v2278_v55, %v2280_v39 }
 0x4fb   : > { %v2318_v29 = vpop.permute.xlu1 %2317  ;;  %v2285_v20 = vsel %vm3250_vm3, %v2281_v19, 0.0  ;;  %v2286_v47 = vsel %vm3258_vm8, %v2282_v54, 0.0 }
 0x4fc   : > { %v2291_v25 = vmul.f32 %v4418_v58, %v2285_v20  ;;  %v2292_v33 = vmul.f32 %v4418_v58, %v2286_v47 }
 0x4fd   : > { %v2322_v34 = vpop.permute.xlu0 %2321 }
 0x4ff   : > { %v2258_v22 = vpop.permute.xlu1 %2257 }
 0x500   : > { %v2261_v11 = vsel %vm892_vm10, %v2256_v18, %v2258_v22  ;;  %v2262_v45 = vsel %vm892_vm10, %v2258_v22, %v2260_v48 }
 0x501   : > { %v2265_v24 = vsel %vm3254_vm6, %v2261_v11, 0.0  ;;  %v2266_v62 = vsel %vm3262_vm9, %v2262_v45, 0.0  ;;  %v2308_v61 = vpop.permute.xlu0 %2307 }
 0x502   : > { %v2271_v3 = vmul.f32 %v2269_v9, %v2265_v24  ;;  %v2272_v39 = vmul.f32 %v2269_v9, %v2266_v62 }
 0x503   : > { %v2194_v60 = vpop.permute.xlu1 %2193 }
 0x504   : > { %v2196_v4 = vsel %vm621_vm7, %v2192_v14, %v2194_v60  ;;  %v2273_v23 = vadd.f32 %v2271_v3, %v2247_v51 }
 0x505   : > { %v2200_v2 = vadd.f32 %v2196_v4, %v2176_v21 }
 0x506   : > { %v2293_v59 = vadd.f32 %v2291_v25, %v2273_v23 }
 0x507   : > { %v2220_v27 = vadd.f32 %v2218_v44, %v2200_v2  ;;  %v2320_v13 = vpop.permute.xlu1 %2319 }
 0x508   : > { %v2323_v57 = vsel %vm1143_vm12, %v2318_v29, %v2320_v13  ;;  %v2324_v6 = vsel %vm1143_vm12, %v2320_v13, %v2322_v34 }
 0x509   : > { %v2240_v48 = vadd.f32 %v2238_v30, %v2220_v27  ;;  %v2327_v0 = vsel %vm3254_vm6, %v2323_v57, 0.0  ;;  %v2328_v36 = vsel %vm3262_vm9, %v2324_v6, 0.0 }
 0x50a   : > { %v2333_v7 = vmul.f32 %v4420_v12, %v2327_v0  ;;  %v2334_v40 = vmul.f32 %v4420_v12, %v2328_v36 }
 0x50b   : > { %v2306_v15 = vpop.permute.xlu1 %2305  ;;  %v2248_v14 = vadd.f32 %v2246_v28, %v2240_v48 }
 0x50c   : > { %v2311_v18 = vsel %vm1094_vm13, %v2306_v15, %v2308_v61 }
 0x50d   : > { %v2315_v52 = vadd.f32 %v2311_v18, %v2293_v59  ;;  %v2274_v63 = vadd.f32 %v2272_v39, %v2248_v14 }
 0x50f   : > { %v2335_v9 = vadd.f32 %v2333_v7, %v2315_v52  ;;  %v2294_v31 = vadd.f32 %v2292_v33, %v2274_v63  ;;  %v2310_v46 = vpop.permute.xlu1 %2309 }
 0x510   : > { %v2312_v32 = vsel %vm1094_vm13, %v2308_v61, %v2310_v46 }
 0x511   : > { %2337 = vst [vmem:[%s278_s29] sm:$0xff] %v2335_v9  ;;  %v2316_v58 = vadd.f32 %v2312_v32, %v2294_v31 }
 0x513   : > { %v2336_v1 = vadd.f32 %v2334_v40, %v2316_v58 }
 0x515   : > { %2338 = vst [vmem:[%s278_s29 + $0x8] sm:$0xff] %v2336_v1 }
 0x516 PF: > { %s17_s24 = sadd.s32 1, %s2620_s24  }
 0x517   : > { %p14_p4 = scmp.ge.s32.totalorder %s17_s24, 4  }
 0x519   :  { %16 = sbr.rel (!%p14_p4) target bundleno = 1 (0x1), region = 78 }

</bundles_post_ra>
